<compile_context>
chip_gen: v5e
topology: v5e:2x2
jax: 0.10.0
libtpu: 0.0.40
codegen_flags: <defaults>
</compile_context>

<pallas_src>
import numpy as np
import jax
import jax.numpy as jnp
from jax.experimental import pallas as pl
from jax.experimental.pallas import tpu as pltpu


def _round_up(x, m):
    return ((x + m - 1) // m) * m


def kl_cvr_kernel(params_ref, img_emb_ref, w_ref, rhs_ref, out_ref):
    # grid = (half h, row-tile r).
    #   h == 0: visual.proj projection vs. normalized text rows  -> logits_per_image
    #   h == 1: img_align   projection vs. raw knowledge rows    -> align_matrix_img
    h = pl.program_id(0)
    scale = params_ref[h]          # exp(logit_scale) or exp(temp_ikc)
    is_text = params_ref[2 + h]    # 1.0 -> L2-normalize RHS rows, 0.0 -> raw rows

    # Projection for this half on the MXU (bf16 operands, f32 accumulation).
    img = img_emb_ref[...].astype(jnp.bfloat16)               # (TB, 768)
    proj = jnp.dot(img, w_ref[...],                           # (768, 512) bf16
                   preferred_element_type=jnp.float32)        # (TB, 512) f32

    # Per-row 1/||row|| (f32 VPU sums, rsqrt on the EUP slot).
    inv_row = jax.lax.rsqrt(jnp.sum(proj * proj, axis=-1, keepdims=True))

    # RHS rows: text rows are normalized (is_text == 1), knowledge rows used
    # raw (is_text == 0).  max() clamp keeps the zero padding rows finite
    # (0 * huge = 0).  Norm math stays f32.
    rhs = rhs_ref[...]                                        # (R_pad, 512) f32
    rhs_ss = jnp.sum(rhs * rhs, axis=-1, keepdims=True)
    rhs_inv = jax.lax.rsqrt(jnp.maximum(rhs_ss, 1e-30))
    rhs_fac = is_text * rhs_inv + (1.0 - is_text)
    rhs_n = (rhs * rhs_fac).astype(jnp.bfloat16)              # (R_pad, 512) bf16

    # Pad RHS rows up to the lane-dense output width so the similarity matmul
    # directly produces a full-width tile (unmasked stores + dense output DMA).
    # Sublane-axis concat at a bf16-tile-aligned offset -> layout-clean.
    pad_rows = out_ref.shape[-1] - rhs_n.shape[0]
    if pad_rows > 0:
        rhs_n = jnp.concatenate(
            [rhs_n, jnp.zeros((pad_rows, rhs_n.shape[-1]), jnp.bfloat16)],
            axis=0)                                           # (OUTC, 512) bf16

    # Similarity (A @ B^T form): bf16 operands, f32 accumulation.
    sim = jax.lax.dot_general(
        proj.astype(jnp.bfloat16), rhs_n,
        dimension_numbers=(((1,), (1,)), ((), ())),
        preferred_element_type=jnp.float32)                   # (TB, OUTC) f32

    # Fold temperature and the image-side row norms into one rank-1 scale.
    out_ref[...] = (scale * inv_row) * sim


def kl_cvr_prepare_params(visual_proj, img_align, logit_scale, temp_ikc):
    """One-time parameter packing. Call ONCE at init, not per step."""
    w_stack = jnp.stack([visual_proj, img_align], axis=0).astype(jnp.bfloat16)
    params = jnp.stack([jnp.exp(logit_scale), jnp.exp(temp_ikc),
                        jnp.asarray(1.0), jnp.asarray(0.0)]).astype(jnp.float32)
    return w_stack, params


def kl_cvr_pallas(image_emb, text_features, x_k, w_stack, params, *, tile_b=256):
    """KL_CVR forward (after the CLIP encoders) as one Pallas kernel call.

    Returns (logits_per_image, logits_per_text, align_matrix_img).
    """
    B, d_img = image_emb.shape
    Bt, d_emb = text_features.shape
    K = x_k.shape[0]
    assert w_stack.shape == (2, d_img, d_emb)

    # Row-padded, stacked similarity RHS (text rows -> half 0, knowledge rows
    # -> half 1).  Tiny (< 100 KiB); the heavy weight is already pre-packed.
    r_pad = _round_up(max(Bt, K, 8), 16)         # bf16-sublane-tile aligned
    outc = _round_up(r_pad, 128)                 # lane-dense output width
    rhs = jnp.zeros((2, r_pad, d_emb), jnp.float32)
    rhs = rhs.at[0, :Bt, :].set(text_features.astype(jnp.float32))
    rhs = rhs.at[1, :K, :].set(x_k.astype(jnp.float32))

    # Row grid: the (d_img, d_emb) weight half stays VMEM-resident across all
    # row tiles of its half; the half axis is "parallel" so v7x's two
    # TensorCores each take one weight half.
    tb = min(B, tile_b)
    if B % tb:
        tb = B            # TODO(synk): mask ragged row tiles for huge non-divisible B
    n_rt = B // tb
    grid = (2, n_rt)

    flops = 2 * (2 * B * d_img * d_emb) + 2 * (2 * B * outc * d_emb)
    bytes_accessed = (2 * d_img * d_emb * 2        # bf16 weight stack
                      + 2 * B * d_img * 4          # image_emb f32 (per half)
                      + 2 * r_pad * d_emb * 4      # packed RHS f32
                      + 2 * B * outc * 4 + 16)     # output slab + scalars

    out = pl.pallas_call(
        kl_cvr_kernel,
        out_shape=jax.ShapeDtypeStruct((2, B, outc), jnp.float32),
        grid=grid,
        in_specs=[
            pl.BlockSpec(memory_space=pltpu.MemorySpace.SMEM),            # params (4,)
            pl.BlockSpec((tb, d_img), lambda h, r: (r, 0)),               # image_emb f32
            pl.BlockSpec((None, d_img, d_emb), lambda h, r: (h, 0, 0)),   # weight half bf16
            pl.BlockSpec((None, r_pad, d_emb), lambda h, r: (h, 0, 0)),   # RHS half f32
        ],
        out_specs=pl.BlockSpec((None, tb, outc), lambda h, r: (h, r, 0)),
        compiler_params=pltpu.CompilerParams(
            dimension_semantics=("parallel", "parallel")),
        cost_estimate=pl.CostEstimate(
            flops=int(flops),
            transcendentals=int(2 * B + 2 * r_pad),
            bytes_accessed=int(bytes_accessed)),
    )(params, image_emb.astype(jnp.float32), w_stack, rhs)

    lpi = out[0, :, :Bt]        # logits_per_image (B, Bt)
    amat = out[1, :, :K]        # align_matrix_img (B, K)
    # logits_per_text is just the transpose; do it outside the kernel.
    return lpi, lpi.T, amat


if __name__ == "__main__":
    key = jax.random.PRNGKey(0)
    ks = jax.random.split(key, 8)

    B = 8              # shared image / text batch (CLIP contrastive setup)
    C, H, W = 4, 16, 16
    T_IN = 32          # synthetic text-encoder input width
    D_IMG = 768        # image-embedding width (fixed by img_align: (768, 512))
    D_EMB = 512        # joint embedding width
    K = 16             # number of knowledge vectors in x_k

    # module inputs (x_v is NCHW, as in PyTorch)
    x_v = jax.random.normal(ks[0], (B, C, H, W), jnp.float32)
    x_u = jax.random.normal(ks[1], (B, T_IN), jnp.float32)
    x_k = jax.random.normal(ks[2], (K, D_EMB), jnp.float32)

    # parameters (deterministic synthetic init, mirroring __init__ shapes)
    logit_scale = jnp.asarray(np.log(1.0 / 0.07), jnp.float32)     # model.logit_scale
    temp_ikc = jnp.asarray(np.log(1.0 / 0.07), jnp.float32)        # nn.Parameter
    img_align = (512 ** -0.5) * jax.random.normal(ks[3], (D_IMG, D_EMB), jnp.float32)
    visual_proj = (768 ** -0.5) * jax.random.normal(ks[4], (D_IMG, D_EMB), jnp.float32)

    # TODO(synk): model.encode_image / model.encode_text are external CLIP
    # encoders not defined in this module; stand in with deterministic linear
    # maps (plain-JAX glue), producing (B, 768) image_emb and (B, 512) text feats.
    w_img_enc = (float(C * H * W) ** -0.5) * jax.random.normal(
        ks[5], (C * H * W, D_IMG), jnp.float32)
    w_txt_enc = (float(T_IN) ** -0.5) * jax.random.normal(
        ks[6], (T_IN, D_EMB), jnp.float32)

    image_emb = x_v.reshape(B, -1) @ w_img_enc         # (B, 768)
    text_features = x_u @ w_txt_enc                    # (B, 512)

    # One-time parameter packing (hoisted out of the per-step hot path).
    w_stack, params = kl_cvr_prepare_params(visual_proj, img_align,
                                            logit_scale, temp_ikc)

    run = jax.jit(kl_cvr_pallas)
    lpi, lpt, amat = run(image_emb, text_features, x_k, w_stack, params)
    jax.block_until_ready((lpi, lpt, amat))

    # plain-JAX f32 reference (same math as the PyTorch forward)
    imf = image_emb @ visual_proj
    imf = imf / jnp.linalg.norm(imf, axis=1, keepdims=True)
    txf = text_features / jnp.linalg.norm(text_features, axis=1, keepdims=True)
    ref_lpi = jnp.exp(logit_scale) * imf @ txf.T
    alg = image_emb @ img_align
    alg = alg / jnp.linalg.norm(alg, axis=1, keepdims=True)
    ref_amat = jnp.exp(temp_ikc) * alg @ x_k.T

    # bf16 MXU operands -> compare at ~2% of the output's max magnitude.
    def check(got, ref, name):
        err = float(jnp.max(jnp.abs(got - ref)))
        scale = float(jnp.max(jnp.abs(ref)))
        assert err <= 2e-2 * scale + 1e-3, f"{name}: max_err={err} scale={scale}"

    check(lpi, ref_lpi, "logits_per_image")
    check(lpt, ref_lpi.T, "logits_per_text")
    check(amat, ref_amat, "align_matrix_img")

    print("KERNEL_OK")
</pallas_src>

<mosaic_0001>
module attributes {stable_mosaic.version = 11 : i64} {
  func.func @kl_cvr_kernel(%arg0: i32, %arg1: i32, %arg2: memref<4xf32, #tpu.memory_space<smem>>, %arg3: memref<8x768xf32, #tpu.memory_space<vmem>>, %arg4: memref<1x768x512xbf16, #tpu.memory_space<vmem>>, %arg5: memref<1x16x512xf32, #tpu.memory_space<vmem>>, %arg6: memref<1x8x128xf32, #tpu.memory_space<vmem>>) attributes {dimension_semantics = [#tpu.dimension_semantics<parallel>, #tpu.dimension_semantics<parallel>], iteration_bounds = array<i64: 2, 1>, scalar_prefetch = 0 : i64, scratch_operands = 0 : i64, tpu.core_type = #tpu.core_type<tc>, window_params = [{transform_indices = @transform_0, window_bounds = array<i64: 4>}, {transform_indices = @transform_1, window_bounds = array<i64: 8, 768>}, {transform_indices = @transform_2, window_bounds = array<i64: 1, 768, 512>}, {transform_indices = @transform_3, window_bounds = array<i64: 1, 16, 512>}, {transform_indices = @transform_4, window_bounds = array<i64: 1, 8, 128>}]} {
    %0 = arith.index_cast %arg0 : i32 to index
    %1 = memref.load %arg2[%0] : memref<4xf32, #tpu.memory_space<smem>>
    %c2_i32 = arith.constant 2 : i32
    %2 = arith.addi %c2_i32, %arg0 : i32
    %3 = arith.index_cast %2 : i32 to index
    %4 = memref.load %arg2[%3] : memref<4xf32, #tpu.memory_space<smem>>
    %c0 = arith.constant 0 : index
    %c0_0 = arith.constant 0 : index
    %5 = vector.load %arg3[%c0, %c0_0] : memref<8x768xf32, #tpu.memory_space<vmem>>, vector<8x768xf32>
    %6 = arith.truncf %5 : vector<8x768xf32> to vector<8x768xbf16>
    %c0_1 = arith.constant 0 : index
    %c0_2 = arith.constant 0 : index
    %c0_3 = arith.constant 0 : index
    %7 = vector.load %arg4[%c0_1, %c0_2, %c0_3] : memref<1x768x512xbf16, #tpu.memory_space<vmem>>, vector<1x768x512xbf16>
    %8 = vector.shape_cast %7 : vector<1x768x512xbf16> to vector<768x512xbf16>
    %cst = arith.constant dense<0.000000e+00> : vector<8x512xf32>
    %9 = tpu.matmul %6, %8, %cst {dimension_numbers = #tpu.dot_dimension_numbers<[1], [0], [0], [1], [0, 0, 1, 1], [], []>} : vector<8x768xbf16>, vector<768x512xbf16>, vector<8x512xf32> -> vector<8x512xf32>
    %10 = arith.mulf %9, %9 : vector<8x512xf32>
    %cst_4 = arith.constant dense<0.000000e+00> : vector<8xf32>
    %11 = vector.multi_reduction <add>, %10, %cst_4 [1] : vector<8x512xf32> to vector<8xf32>
    %12 = vector.shape_cast %11 : vector<8xf32> to vector<8x1xf32>
    %13 = math.rsqrt %12 : vector<8x1xf32>
    %c0_5 = arith.constant 0 : index
    %c0_6 = arith.constant 0 : index
    %c0_7 = arith.constant 0 : index
    %14 = vector.load %arg5[%c0_5, %c0_6, %c0_7] : memref<1x16x512xf32, #tpu.memory_space<vmem>>, vector<1x16x512xf32>
    %15 = vector.shape_cast %14 : vector<1x16x512xf32> to vector<16x512xf32>
    %16 = arith.mulf %15, %15 : vector<16x512xf32>
    %cst_8 = arith.constant dense<0.000000e+00> : vector<16xf32>
    %17 = vector.multi_reduction <add>, %16, %cst_8 [1] : vector<16x512xf32> to vector<16xf32>
    %18 = vector.shape_cast %17 : vector<16xf32> to vector<16x1xf32>
    %cst_9 = arith.constant 1.000000e-30 : f32
    %19 = vector.broadcast %cst_9 : f32 to vector<16x1xf32>
    %20 = arith.maximumf %18, %19 : vector<16x1xf32>
    %21 = math.rsqrt %20 : vector<16x1xf32>
    %22 = vector.broadcast %4 : f32 to vector<16x1xf32>
    %23 = arith.mulf %22, %21 : vector<16x1xf32>
    %cst_10 = arith.constant 1.000000e+00 : f32
    %24 = arith.subf %cst_10, %4 : f32
    %25 = vector.broadcast %24 : f32 to vector<16x1xf32>
    %26 = arith.addf %23, %25 : vector<16x1xf32>
    %27 = vector.broadcast %26 : vector<16x1xf32> to vector<16x512xf32>
    %28 = arith.mulf %15, %27 : vector<16x512xf32>
    %29 = arith.truncf %28 : vector<16x512xf32> to vector<16x512xbf16>
    %cst_11 = arith.constant 0.000000e+00 : bf16
    %30 = vector.broadcast %cst_11 : bf16 to vector<112x512xbf16>
    %31 = tpu.concatenate %29, %30 in 0 : vector<16x512xbf16>, vector<112x512xbf16> -> vector<128x512xbf16>
    %32 = arith.truncf %9 : vector<8x512xf32> to vector<8x512xbf16>
    %cst_12 = arith.constant dense<0.000000e+00> : vector<8x128xf32>
    %33 = tpu.matmul %32, %31, %cst_12 {dimension_numbers = #tpu.dot_dimension_numbers<[1], [1], [0], [0], [0, 0, 1, 0], [], []>} : vector<8x512xbf16>, vector<128x512xbf16>, vector<8x128xf32> -> vector<8x128xf32>
    %34 = vector.broadcast %1 : f32 to vector<8x1xf32>
    %35 = arith.mulf %34, %13 : vector<8x1xf32>
    %36 = vector.broadcast %35 : vector<8x1xf32> to vector<8x128xf32>
    %37 = arith.mulf %36, %33 : vector<8x128xf32>
    %c0_13 = arith.constant 0 : index
    %c0_14 = arith.constant 0 : index
    %c0_15 = arith.constant 0 : index
    %38 = vector.load %arg6[%c0_13, %c0_14, %c0_15] : memref<1x8x128xf32, #tpu.memory_space<vmem>>, vector<1x8x128xf32>
    %39 = vector.shape_cast %38 : vector<1x8x128xf32> to vector<8x128xf32>
    %40 = vector.shape_cast %37 : vector<8x128xf32> to vector<1x8x128xf32>
    tpu.vector_store %arg6[%c0_13, %c0_14, %c0_15], %40 {strides = array<i32>} : memref<1x8x128xf32, #tpu.memory_space<vmem>>, vector<1x8x128xf32>,
    return
  }
  func.func @transform_0(%arg0: i32, %arg1: i32) -> i32 {
    %c0_i32 = arith.constant 0 : i32
    %c0_i32_0 = arith.constant 0 : i32
    return %c0_i32 : i32
  }
  func.func @transform_1(%arg0: i32, %arg1: i32) -> (i32, i32) {
    %c0_i32 = arith.constant 0 : i32
    %c0_i32_0 = arith.constant 0 : i32
    return %arg1, %c0_i32 : i32, i32
  }
  func.func @transform_2(%arg0: i32, %arg1: i32) -> (i32, i32, i32) {
    %c0_i32 = arith.constant 0 : i32
    %c0_i32_0 = arith.constant 0 : i32
    %c0_i32_1 = arith.constant 0 : i32
    return %arg0, %c0_i32, %c0_i32_0 : i32, i32, i32
  }
  func.func @transform_3(%arg0: i32, %arg1: i32) -> (i32, i32, i32) {
    %c0_i32 = arith.constant 0 : i32
    %c0_i32_0 = arith.constant 0 : i32
    %c0_i32_1 = arith.constant 0 : i32
    return %arg0, %c0_i32, %c0_i32_0 : i32, i32, i32
  }
  func.func @transform_4(%arg0: i32, %arg1: i32) -> (i32, i32, i32) {
    %c0_i32 = arith.constant 0 : i32
    %c0_i32_0 = arith.constant 0 : i32
    return %arg0, %arg1, %c0_i32 : i32, i32, i32
  }
}

</mosaic_0001>

<bundles_post_ra>
// kernel: kl_cvr_pallas.1
= control target key start
LH: loop header
LB: loop body
LE: loop exit
PB: predicated region body
PF: predicated region fallthrough
CT: control target
= control target key end

     0   :  { %9 = vsyncpa [#allocation4], 0  ;;  %s3909_s0 = inlined_call_operand.hbm [shape: f32[4], index: 0, kind: input, shape index: {}]   ;;  %s3910_s1 = inlined_call_operand.hbm [shape: f32[8,768], index: 1, kind: input, shape index: {}]   ;;  %s3911_s2 = inlined_call_operand.hbm [shape: bf16[2,768,512], index: 2, kind: input, shape index: {}]   ;;  %s3912_s3 = inlined_call_operand.vmem [shape: f32[2,16,512], index: 3, kind: input, shape index: {}]   ;;  %s3913_s4 = inlined_call_operand.vmem [shape: f32[2,8,128], index: 4, kind: output, shape index: {}]  }
   0x1   :  { %10 = vsyncpa [#allocation3], 0 }
   0x2   :  { %11 = vsyncpa [#allocation7], 0 }
   0x3   :  { %13 = vsyncpa [#allocation7 + $0x1], 0  ;;  %s3297_s15 = smov 0   ;;  %s3299_s16 = smov 0  }
   0x4   :  { %s3301_s17 = smov 0   ;;  %s3303_s18 = smov 0  }
   0x5   :  { %s3305_s19 = smov 0   ;;  %s3307_s20 = smov 0  }
   0x6 LB: > { %s2062_s21 = sadd.s32 4294967295, %s3266_s20   ;;  %s85_s22 = sadd.s32 1, %s3254_s17  ;;  %s3266_s20 = sphi %s3307_s20, %s19_s20   ;;  %s3262_s19 = sphi %s3305_s19, %s3924_s19   ;;  %s3258_s18 = sphi %s3303_s18, %s3923_s18   ;;  %s3254_s17 = sphi %s3301_s17, %s3922_s17   ;;  %s3250_s16 = sphi %s3299_s16, %s3921_s16   ;;  %s3246_s15 = sphi %s3297_s15, %s3920_s15  }
   0x7   : > { %p92_p0 = scmp.ne.s32.totalorder %s3254_s17, %s3250_s16  ;;  %p93_p1 = scmp.eq.s32.totalorder %s3266_s20, 0 }
   0x8   : > { %p98_p2 = scmp.ne.s32.totalorder %s3250_s16, %s3246_s15  ;;  %p3331_p3 = scmp.eq.s32.totalorder %s2062_s21, 0 }
   0x9   : > { %p94_p4 = por %p93_p1, %p92_p0  ;;  %p2064_p5 = scmp.ge.s32.totalorder %s3266_s20, 1 }
   0xa   : > { %p3338_p6 = por %p3331_p3, %p98_p2  ;;  %p163_p7 = scmp.lt.s32.totalorder %s3266_s20, 3 }
   0xb   : > { %s175_s27 = sshll.u32 %s3909_s0, 4  ;;  %p3064_p10 = scmp.lt.s32.totalorder %s3266_s20, 2  ;;  %s176_s27 = int_to_ptr.hbm [resolvable:$true] %s175_s27 }
   0xc   : > { %p3346_p8 = pnand %p2064_p5, %p163_p7  ;;  %s188_s5 = sshll.u32 %s3910_s1, 4  ;;  %s189_s5 = int_to_ptr.hbm [resolvable:$true] %s188_s5 }
   0xd   : > { %p3358_p12 = pnand %p3064_p10, %p94_p4  ;;  %s3268_s7 = smov [#allocation5]  }
   0xe   : > { %p3051_p9 = pneg %p3346_p8  ;;  %s190_s8 = sshll.u32 %s3268_s7, 4  ;;  %s191_s8 = int_to_ptr.vmem [resolvable:$true] %s190_s8 }
   0xf   : > { %s3269_s9 = smov [#allocation2]   ;;  %s201_s10 = sand.u32 1, %s3254_s17  }
  0x10   : > { %p3052_p11 = pnand %p3051_p9, %p3331_p3  ;;  %s31_s11 = sadd.s32 1, %s3262_s19 }
  0x11   : > { %p33_p13 = scmp.ge.s32.totalorder %s31_s11, 2  ;;  %s3038_s12 = smul.u32 1536, %s201_s10 }
  0x12   : > { %3054 = dma.hbm_to_smem (!%p3052_p11), %s176_s27, 16, %s3269_s9, [#allocation4]  }
  0x13   : > { %3057 = dma.hbm_to_vmem [thread:$0]  (!%p3052_p11), %s189_s5, 768, %s191_s8, [#allocation3]  }
  0x14   : > { %s3039_s13 = smul.u32 1536, %s3262_s19  ;;  %s3926_s11 = smov (%p33_p13, %s31_s11), 0 }
  0x15   : > { %s82_s25 = ssub.s32 %s3262_s19, %s3926_s11  ;;  %s205_s27 = scalar_lea.vmem [#allocation6], %s3038_s12 }
  0x16   : > { %s210_s21 = scalar_lea.hbm %s3911_s2, %s3039_s13  ;;  %p83_p0 = scmp.eq.s32.totalorder %s82_s25, 0 }
  0x17   : > { %s211_s26 = sshll.u32 %s210_s21, 4  ;;  %s213_s29 = sshll.u32 %s205_s27, 4  ;;  %s212_s26 = int_to_ptr.hbm [resolvable:$true] %s211_s26  ;;  %s214_s29 = int_to_ptr.vmem [resolvable:$true] %s213_s29 }
  0x18   : > { %s3375_s30 = scalar_select %p83_p0, %s3254_s17, %s85_s22  }
  0x19   : > { %s202_s5 = scalar_lea.sflag [#allocation7], %s201_s10  ;;  %s3270_s7 = smov 256  }
  0x1a   : > { %s3271_s8 = smov 16   ;;  %233 = sbr.rel (%p3346_p8) target bundleno = 516 (0x204), region = 36 }
  0x1b   : > { %3061 = dma.hbm_to_vmem [thread:$0]  (!%p3358_p12), %s212_s26, 24576, %s214_s29, %s202_s5, %s3270_s7, %s3270_s7, %s3271_s8  }
  0x1f   : > { %3233 = dma.done.wait (%p3331_p3), [#allocation4], 16  }
  0x20   : > { %3235 = vsyncadd (%p3331_p3), [#allocation4], 4294967280 }
  0x21   : > { %3237 = dma.done.wait (%p3331_p3), [#allocation3], 768  }
  0x22   : > { %3239 = vsyncadd (%p3331_p3), [#allocation3], 4294966528  ;;  %s245_s22 = sand.u32 1, %s3250_s16  }
  0x23   : > { %s3040_s6 = smul.u32 1536, %s245_s22  ;;  %s246_s9 = scalar_lea.sflag [#allocation7], %s245_s22 }
  0x25   : > { %s3390_s10 = scalar_lea.vmem [#allocation6], %s3040_s6 }
  0x26   : > { %3241 = dma.done.wait (%p3338_p6), %s246_s9, 24576  }
  0x27   : > { %3243 = vsyncadd (%p3338_p6), %s246_s9, 4294942720 }
  0x28   : > { %255 = sfence }
  0x29   : > { %v2189_v0 = vld [vmem:[%s3390_s10 + $0xe0] sm:$0xf]  ;;  %v2876_v1 = vld [vmem:[%s3390_s10 + $0xec] sm:$0xf0]  ;;  %p283_p1 = scmp.lt.s32.totalorder %s3258_s18, 1  ;;  %s297_s14 = sadd.s32 2, %s3258_s18 }
  0x2a   : > { %v2317_v2 = vld [vmem:[%s3390_s10 + $0x1e0] sm:$0xf]  ;;  %v2190_v3 = vor.u32 %v2876_v1, %v2189_v0  ;;  %v2908_v4 = vld [vmem:[%s3390_s10 + $0x1ec] sm:$0xf0]  ;;  %s3802_s15 = sld [smem:[#allocation2 + %s297_s14]] }
  0x2b   : > { %v2445_v5 = vld [vmem:[%s3390_s10 + $0x2e0] sm:$0xf]  ;;  %v2940_v6 = vld [vmem:[%s3390_s10 + $0x2ec] sm:$0xf0]  ;;  %v2318_v7 = vor.u32 %v2908_v4, %v2317_v2  ;;  %s3467_s23 = scalar_select %p283_p1, %s3258_s18, 1 }
  0x2c   : > { %v2446_v8 = vor.u32 %v2940_v6, %v2445_v5  ;;  %v2573_v9 = vld [vmem:[%s3390_s10 + $0x3e0] sm:$0xf]  ;;  %v2972_v10 = vld [vmem:[%s3390_s10 + $0x3ec] sm:$0xf0]  ;;  %1463 = vmatpush.bf16.msra.mxu0 %v2190_v3  ;;  %s296_s25 = sld [smem:[#allocation2 + %s3258_s18]] }
  0x2d   : > { %v2173_v11 = vld [vmem:[%s3390_s10 + $0xc0] sm:$0xf]  ;;  %v2574_v12 = vor.u32 %v2972_v10, %v2573_v9  ;;  %v2872_v13 = vld [vmem:[%s3390_s10 + $0xcc] sm:$0xf0]  ;;  %1476 = vmatpush.bf16.msra.mxu1 %v2318_v7  ;;  %s2845_s24 = sshll.u32 %s3467_s23, 6  ;;  %s2074_s26 = sshll.u32 %s3467_s23, 3 }
  0x2e   : > { %v2301_v14 = vld [vmem:[%s3390_s10 + $0x1c0] sm:$0xf]  ;;  %v2904_v15 = vld [vmem:[%s3390_s10 + $0x1cc] sm:$0xf0]  ;;  %1489 = vmatpush.bf16.msra.mxu2 %v2446_v8  ;;  %v2174_v16 = vor.u32 %v2872_v13, %v2173_v11  ;;  %s3478_s13 = scalar_lea.vmem %s3912_s3, %s2845_s24  ;;  %s294_s5 = scalar_lea.vmem %s3913_s4, %s2074_s26 }
  0x2f   : > { %v2302_v17 = vor.u32 %v2904_v15, %v2301_v14  ;;  %v2429_v18 = vld [vmem:[%s3390_s10 + $0x2c0] sm:$0xf]  ;;  %v2936_v19 = vld [vmem:[%s3390_s10 + $0x2cc] sm:$0xf0]  ;;  %1502 = vmatpush.bf16.msra.mxu3 %v2574_v12 }
  0x30   : > { %v2557_v20 = vld [vmem:[%s3390_s10 + $0x3c0] sm:$0xf]  ;;  %v2430_v21 = vor.u32 %v2936_v19, %v2429_v18  ;;  %v2968_v22 = vld [vmem:[%s3390_s10 + $0x3cc] sm:$0xf0]  ;;  %1464 = vmatpush.bf16.msra.mxu0 %v2174_v16  ;;  %s1845_s21 = ssub.f32 1.0, %s3802_s15 }
  0x31   : > { %v2157_v23 = vld [vmem:[%s3390_s10 + $0xa0] sm:$0xf]  ;;  %v2868_v24 = vld [vmem:[%s3390_s10 + $0xac] sm:$0xf0]  ;;  %v2558_v25 = vor.u32 %v2968_v22, %v2557_v20  ;;  %1477 = vmatpush.bf16.msra.mxu1 %v2302_v17 }
  0x32   : > { %v2285_v26 = vld [vmem:[%s3390_s10 + $0x1a0] sm:$0xf]  ;;  %v2900_v27 = vld [vmem:[%s3390_s10 + $0x1ac] sm:$0xf0]  ;;  %v2158_v29 = vor.u32 %v2868_v24, %v2157_v23  ;;  %1490 = vmatpush.bf16.msra.mxu2 %v2430_v21 }
  0x33   : > { %v2413_v28 = vld [vmem:[%s3390_s10 + $0x2a0] sm:$0xf]  ;;  %v2932_v30 = vld [vmem:[%s3390_s10 + $0x2ac] sm:$0xf0]  ;;  %v2286_v33 = vor.u32 %v2900_v27, %v2285_v26  ;;  %1503 = vmatpush.bf16.msra.mxu3 %v2558_v25 }
  0x34   : > { %v2541_v31 = vld [vmem:[%s3390_s10 + $0x3a0] sm:$0xf]  ;;  %v2964_v32 = vld [vmem:[%s3390_s10 + $0x3ac] sm:$0xf0]  ;;  %v2414_v34 = vor.u32 %v2932_v30, %v2413_v28  ;;  %1465 = vmatpush.bf16.msra.mxu0 %v2158_v29 }
  0x35   : > { %v2141_v35 = vld [vmem:[%s3390_s10 + $0x80] sm:$0xf]  ;;  %v2864_v36 = vld [vmem:[%s3390_s10 + $0x8c] sm:$0xf0]  ;;  %v2542_v38 = vor.u32 %v2964_v32, %v2541_v31  ;;  %1478 = vmatpush.bf16.msra.mxu1 %v2286_v33  ;;  %v2874_v32 = vld [vmem:[%s3390_s10 + $0xe4] sm:$0xf] }
  0x36   : > { %v2269_v37 = vld [vmem:[%s3390_s10 + $0x180] sm:$0xf]  ;;  %v2896_v39 = vld [vmem:[%s3390_s10 + $0x18c] sm:$0xf0]  ;;  %v2142_v44 = vor.u32 %v2864_v36, %v2141_v35  ;;  %1491 = vmatpush.bf16.msra.mxu2 %v2414_v34  ;;  %v2191_v34 = vld [vmem:[%s3390_s10 + $0xf0] sm:$0xf0] }
  0x37   : > { %v2397_v40 = vld [vmem:[%s3390_s10 + $0x280] sm:$0xf]  ;;  %v2928_v41 = vld [vmem:[%s3390_s10 + $0x28c] sm:$0xf0]  ;;  %v2270_v45 = vor.u32 %v2896_v39, %v2269_v37  ;;  %1504 = vmatpush.bf16.msra.mxu3 %v2542_v38  ;;  %v2906_v35 = vld [vmem:[%s3390_s10 + $0x1e4] sm:$0xf] }
  0x38   : > { %v2525_v42 = vld [vmem:[%s3390_s10 + $0x380] sm:$0xf]  ;;  %v2960_v43 = vld [vmem:[%s3390_s10 + $0x38c] sm:$0xf0]  ;;  %v2398_v46 = vor.u32 %v2928_v41, %v2397_v40  ;;  %1466 = vmatpush.bf16.msra.mxu0 %v2142_v44  ;;  %v2319_v36 = vld [vmem:[%s3390_s10 + $0x1f0] sm:$0xf0] }
  0x39   : > { %v2125_v47 = vld [vmem:[%s3390_s10 + $0x60] sm:$0xf]  ;;  %v2860_v48 = vld [vmem:[%s3390_s10 + $0x6c] sm:$0xf0]  ;;  %v2526_v50 = vor.u32 %v2960_v43, %v2525_v42  ;;  %1479 = vmatpush.bf16.msra.mxu1 %v2270_v45 }
  0x3a   : > { %v2253_v49 = vld [vmem:[%s3390_s10 + $0x160] sm:$0xf]  ;;  %v2892_v51 = vld [vmem:[%s3390_s10 + $0x16c] sm:$0xf0]  ;;  %v2126_v56 = vor.u32 %v2860_v48, %v2125_v47  ;;  %1492 = vmatpush.bf16.msra.mxu2 %v2398_v46  ;;  %v2870_v46 = vld [vmem:[%s3390_s10 + $0xc4] sm:$0xf] }
  0x3b   : > { %v2381_v52 = vld [vmem:[%s3390_s10 + $0x260] sm:$0xf]  ;;  %v2924_v53 = vld [vmem:[%s3390_s10 + $0x26c] sm:$0xf0]  ;;  %v2254_v57 = vor.u32 %v2892_v51, %v2253_v49  ;;  %1505 = vmatpush.bf16.msra.mxu3 %v2526_v50  ;;  %v2175_v47 = vld [vmem:[%s3390_s10 + $0xd0] sm:$0xf0]  ;;  %v2194_v50 = vor.u32 %v2874_v32, %v2191_v34  ;;  %v2322_v51 = vor.u32 %v2906_v35, %v2319_v36 }
  0x3c   : > { %v2509_v54 = vld [vmem:[%s3390_s10 + $0x360] sm:$0xf]  ;;  %v2956_v55 = vld [vmem:[%s3390_s10 + $0x36c] sm:$0xf0]  ;;  %v2382_v58 = vor.u32 %v2924_v53, %v2381_v52  ;;  %1467 = vmatpush.bf16.msra.mxu0 %v2126_v56  ;;  %v300_v48 = vld [vmem:[#allocation5 + $0x8] sm:$0xff] }
  0x3d   : > { %v2109_v59 = vld [vmem:[%s3390_s10 + $0x40] sm:$0xf]  ;;  %v2856_v60 = vld [vmem:[%s3390_s10 + $0x4c] sm:$0xf0]  ;;  %v2510_v62 = vor.u32 %v2956_v55, %v2509_v54  ;;  %1480 = vmatpush.bf16.msra.mxu1 %v2254_v57  ;;  %v1795_v53 = vld [vmem:[%s3478_s13 + $0x8] sm:$0xff] }
  0x3e   : > { %v2237_v61 = vld [vmem:[%s3390_s10 + $0x140] sm:$0xf]  ;;  %v2888_v63 = vld [vmem:[%s3390_s10 + $0x14c] sm:$0xf0]  ;;  %v2110_v4 = vor.u32 %v2856_v60, %v2109_v59  ;;  %1493 = vmatpush.bf16.msra.mxu2 %v2382_v58  ;;  %v1797_v55 = vld [vmem:[%s3478_s13 + $0x18] sm:$0xff]  ;;  %v1803_v57 = vmul.f32 %v1795_v53, %v1795_v53 }
  0x3f   : > { %v2365_v0 = vld [vmem:[%s3390_s10 + $0x240] sm:$0xf]  ;;  %v2920_v1 = vld [vmem:[%s3390_s10 + $0x24c] sm:$0xf0]  ;;  %v2238_v6 = vor.u32 %v2888_v63, %v2237_v61  ;;  %1506 = vmatpush.bf16.msra.mxu3 %v2510_v62  ;;  %v2902_v60 = vld [vmem:[%s3390_s10 + $0x1c4] sm:$0xf] }
  0x40   : > { %v2493_v2 = vld [vmem:[%s3390_s10 + $0x340] sm:$0xf]  ;;  %v2952_v3 = vld [vmem:[%s3390_s10 + $0x34c] sm:$0xf0]  ;;  %v2366_v7 = vor.u32 %v2920_v1, %v2365_v0  ;;  %1468 = vmatpush.bf16.msra.mxu0 %v2110_v4  ;;  %v2303_v62 = vld [vmem:[%s3390_s10 + $0x1d0] sm:$0xf0]  ;;  %v1805_v4 = vmul.f32 %v1797_v55, %v1797_v55 }
  0x41   : > { %v2093_v5 = vld [vmem:[%s3390_s10 + $0x20] sm:$0xf]  ;;  %v2852_v8 = vld [vmem:[%s3390_s10 + $0x2c] sm:$0xf0]  ;;  %v2494_v11 = vor.u32 %v2952_v3, %v2493_v2  ;;  %1481 = vmatpush.bf16.msra.mxu1 %v2238_v6  ;;  %v1799_v63 = vld [vmem:[%s3478_s13 + $0x28] sm:$0xff]  ;;  %v3495_v3 = vpack.c.bf16 %v300_v48, %v300_v48 }
  0x42   : > { %v2221_v9 = vld [vmem:[%s3390_s10 + $0x120] sm:$0xf]  ;;  %v2884_v10 = vld [vmem:[%s3390_s10 + $0x12c] sm:$0xf0]  ;;  %v2094_v18 = vor.u32 %v2852_v8, %v2093_v5  ;;  %1494 = vmatpush.bf16.msra.mxu2 %v2366_v7  ;;  %v1807_v6 = vmul.f32 %v1799_v63, %v1799_v63  ;;  %v2862_v35 = vld [vmem:[%s3390_s10 + $0x84] sm:$0xf] }
  0x43   : > { %v2349_v12 = vld [vmem:[%s3390_s10 + $0x220] sm:$0xf]  ;;  %v2916_v13 = vld [vmem:[%s3390_s10 + $0x22c] sm:$0xf0]  ;;  %v2222_v23 = vor.u32 %v2884_v10, %v2221_v9  ;;  %1507 = vmatpush.bf16.msra.mxu3 %v2494_v11  ;;  %v2178_v9 = vor.u32 %v2870_v46, %v2175_v47  ;;  %v2143_v36 = vld [vmem:[%s3390_s10 + $0x90] sm:$0xf0] }
  0x44   : > { %v2477_v14 = vld [vmem:[%s3390_s10 + $0x320] sm:$0xf]  ;;  %v2948_v15 = vld [vmem:[%s3390_s10 + $0x32c] sm:$0xf0]  ;;  %v2350_v24 = vor.u32 %v2916_v13, %v2349_v12  ;;  %1469 = vmatpush.bf16.msra.mxu0 %v2094_v18  ;;  %v2255_v53 = vld [vmem:[%s3390_s10 + $0x170] sm:$0xf0] }
  0x45   : > { %v2077_v16 = vld [vmem:[%s3390_s10] sm:$0xf]  ;;  %v2848_v17 = vld [vmem:[%s3390_s10 + $0xc] sm:$0xf0]  ;;  %v2478_v27 = vor.u32 %v2948_v15, %v2477_v14  ;;  %1482 = vmatpush.bf16.msra.mxu1 %v2222_v23  ;;  %v2306_v14 = vor.u32 %v2902_v60, %v2303_v62  ;;  %v2854_v62 = vld [vmem:[%s3390_s10 + $0x44] sm:$0xf] }
  0x46   : > { %v2205_v19 = vld [vmem:[%s3390_s10 + $0x100] sm:$0xf]  ;;  %v2880_v20 = vld [vmem:[%s3390_s10 + $0x10c] sm:$0xf0]  ;;  %v2078_v33 = vor.u32 %v2848_v17, %v2077_v16  ;;  %1495 = vmatpush.bf16.msra.mxu2 %v2350_v24  ;;  %v2866_v16 = vld [vmem:[%s3390_s10 + $0xa4] sm:$0xf] }
  0x47   : > { %v2333_v21 = vld [vmem:[%s3390_s10 + $0x200] sm:$0xf]  ;;  %v2912_v22 = vld [vmem:[%s3390_s10 + $0x20c] sm:$0xf0]  ;;  %v2206_v37 = vor.u32 %v2880_v20, %v2205_v19  ;;  %1508 = vmatpush.bf16.msra.mxu3 %v2478_v27  ;;  %v2159_v17 = vld [vmem:[%s3390_s10 + $0xb0] sm:$0xf0] }
  0x48   : > { %v2461_v25 = vld [vmem:[%s3390_s10 + $0x300] sm:$0xf]  ;;  %v2944_v26 = vld [vmem:[%s3390_s10 + $0x30c] sm:$0xf0]  ;;  %v2334_v38 = vor.u32 %v2912_v22, %v2333_v21  ;;  %1470 = vmatpush.bf16.msra.mxu0 %v2078_v33  ;;  %v2898_v20 = vld [vmem:[%s3390_s10 + $0x1a4] sm:$0xf]  ;;  %v2162_v27 = vor.u32 %v2866_v16, %v2159_v17 }
  0x49   : > { %v2701_v28 = vld [vmem:[%s3390_s10 + $0x4e0] sm:$0xf]  ;;  %v3004_v29 = vld [vmem:[%s3390_s10 + $0x4ec] sm:$0xf0]  ;;  %v2462_v42 = vor.u32 %v2944_v26, %v2461_v25  ;;  %1483 = vmatpush.bf16.msra.mxu1 %v2206_v37  ;;  %v2287_v21 = vld [vmem:[%s3390_s10 + $0x1b0] sm:$0xf0] }
  0x4a   : > { %v2829_v30 = vld [vmem:[%s3390_s10 + $0x5e0] sm:$0xf]  ;;  %v3036_v31 = vld [vmem:[%s3390_s10 + $0x5ec] sm:$0xf0]  ;;  %v2702_v43 = vor.u32 %v3004_v29, %v2701_v28  ;;  %1496 = vmatpush.bf16.msra.mxu2 %v2334_v38  ;;  %v1801_v22 = vld [vmem:[%s3478_s13 + $0x38] sm:$0xff] }
  0x4b   : > { %v2685_v39 = vld [vmem:[%s3390_s10 + $0x4c0] sm:$0xf]  ;;  %v3000_v40 = vld [vmem:[%s3390_s10 + $0x4cc] sm:$0xf0]  ;;  %v2830_v49 = vor.u32 %v3036_v31, %v2829_v30  ;;  %1509 = vmatpush.bf16.msra.mxu3 %v2462_v42  ;;  %v2290_v31 = vor.u32 %v2898_v20, %v2287_v21  ;;  %v1809_v32 = vmul.f32 %v1801_v22, %v1801_v22  ;;  %v2894_v37 = vld [vmem:[%s3390_s10 + $0x184] sm:$0xf]  ;;  %v2146_v42 = vor.u32 %v2862_v35, %v2143_v36 }
  0x4c   : > { %v299_v41 = vld [vmem:[#allocation5] sm:$0xff]  ;;  %v2813_v44 = vld [vmem:[%s3390_s10 + $0x5c0] sm:$0xf]  ;;  %v2686_v59 = vor.u32 %v3000_v40, %v2685_v39  ;;  %1515 = vmatpush.bf16.msrb.mxu0 %v2702_v43  ;;  %1484 = vmatmul.bf16.vlgmr.msra.gmra.mxu1 %v3495_v3  ;;  %v302_v40 = vld [vmem:[#allocation5 + $0x18] sm:$0xff] }
  0x4d   : > { %v3032_v45 = vld [vmem:[%s3390_s10 + $0x5cc] sm:$0xf0]  ;;  %v1796_v54 = vld [vmem:[%s3478_s13 + $0x10] sm:$0xff]  ;;  %v3493_v2 = vpack.c.bf16 %v299_v41, %v299_v41  ;;  %1528 = vmatpush.bf16.msrb.mxu1 %v2830_v49  ;;  %v2271_v38 = vld [vmem:[%s3390_s10 + $0x190] sm:$0xf0]  ;;  %v3522_v46 = vpack.c.bf16 %v302_v40, %v302_v40 }
  0x4e   : > { %v1794_v52 = vld [vmem:[%s3478_s13] sm:$0xff]  ;;  %v1804_v58 = vmul.f32 %v1796_v54, %v1796_v54  ;;  %v1800_v0 = vld [vmem:[%s3478_s13 + $0x30] sm:$0xff]  ;;  %1541 = vmatpush.bf16.msrb.mxu2 %v2194_v50  ;;  %v2814_v8 = vor.u32 %v3032_v45, %v2813_v44  ;;  %v2274_v48 = vor.u32 %v2894_v37, %v2271_v38 }
  0x4f   : > { %v1802_v56 = vmul.f32 %v1794_v52, %v1794_v52  ;;  %v1798_v61 = vld [vmem:[%s3478_s13 + $0x20] sm:$0xff]  ;;  %v301_v7 = vld [vmem:[#allocation5 + $0x10] sm:$0xff]  ;;  %1554 = vmatpush.bf16.msrb.mxu3 %v2322_v51  ;;  %v1808_v18 = vmul.f32 %v1800_v0, %v1800_v0  ;;  %1471 = vmatmul.bf16.vlgmr.msra.gmra.mxu0 %v3493_v2 }
  0x50   : > { %v1806_v1 = vmul.f32 %v1798_v61, %v1798_v61  ;;  %v2669_v10 = vld [vmem:[%s3390_s10 + $0x4a0] sm:$0xf]  ;;  %v2996_v11 = vld [vmem:[%s3390_s10 + $0x4ac] sm:$0xf0]  ;;  %v3508_v23 = vpack.c.bf16 %v301_v7, %v301_v7  ;;  %1516 = vmatpush.bf16.msrb.mxu0 %v2686_v59  ;;  %v2858_v50 = vld [vmem:[%s3390_s10 + $0x64] sm:$0xf]  ;;  %1510 = vmatmul.bf16.vlgmr.msra.gmra.mxu3 %v3522_v46 }
  0x51   : > { %v1810_v5 = vadd.f32 %v1803_v57, %v1802_v56  ;;  %v2797_v12 = vld [vmem:[%s3390_s10 + $0x5a0] sm:$0xf]  ;;  %v3028_v15 = vld [vmem:[%s3390_s10 + $0x5ac] sm:$0xf0]  ;;  %v2670_v25 = vor.u32 %v2996_v11, %v2669_v10  ;;  %1529 = vmatpush.bf16.msrb.mxu1 %v2814_v8  ;;  %v2127_v51 = vld [vmem:[%s3390_s10 + $0x70] sm:$0xf0] }
  0x52   : > { %v1815_v19 = vadd.f32 %v1807_v6, %v1806_v1  ;;  %1542 = vmatpush.bf16.msrb.mxu2 %v2178_v9  ;;  %v2798_v26 = vor.u32 %v3028_v15, %v2797_v12  ;;  %v2653_v28 = vld [vmem:[%s3390_s10 + $0x480] sm:$0xf]  ;;  %v2992_v29 = vld [vmem:[%s3390_s10 + $0x48c] sm:$0xf0]  ;;  %v2890_v52 = vld [vmem:[%s3390_s10 + $0x164] sm:$0xf]  ;;  %v2130_v56 = vor.u32 %v2858_v50, %v2127_v51 }
  0x53   : > { %v1811_v13 = vadd.f32 %v1810_v5, %v1804_v58  ;;  %v2781_v30 = vld [vmem:[%s3390_s10 + $0x580] sm:$0xf]  ;;  %1555 = vmatpush.bf16.msrb.mxu3 %v2306_v14  ;;  %v3024_v34 = vld [vmem:[%s3390_s10 + $0x58c] sm:$0xf0]  ;;  %1497 = vmatmul.bf16.vlgmr.msra.gmra.mxu2 %v3508_v23  ;;  %v2654_v39 = vor.u32 %v2992_v29, %v2653_v28  ;;  %v2258_v60 = vor.u32 %v2890_v52, %v2255_v53  ;;  %v2111_v63 = vld [vmem:[%s3390_s10 + $0x50] sm:$0xf0] }
  0x54   : > { %v1816_v33 = vadd.f32 %v1815_v19, %v1808_v18  ;;  %1517 = vmatpush.bf16.msrb.mxu0 %v2670_v25  ;;  %v2782_v41 = vor.u32 %v3024_v34, %v2781_v30  ;;  %v2637_v43 = vld [vmem:[%s3390_s10 + $0x460] sm:$0xf]  ;;  %v2988_v44 = vld [vmem:[%s3390_s10 + $0x46c] sm:$0xf0]  ;;  %v2886_v0 = vld [vmem:[%s3390_s10 + $0x144] sm:$0xf]  ;;  %v2114_v6 = vor.u32 %v2854_v62, %v2111_v63 }
  0x55   : > { %v1812_v24 = vadd.f32 %v1811_v13, %v1805_v4  ;;  %1530 = vmatpush.bf16.msrb.mxu1 %v2798_v26  ;;  %v2765_v45 = vld [vmem:[%s3390_s10 + $0x560] sm:$0xf]  ;;  %v3020_v49 = vld [vmem:[%s3390_s10 + $0x56c] sm:$0xf0]  ;;  %v2638_v54 = vor.u32 %v2988_v44, %v2637_v43  ;;  %v2239_v1 = vld [vmem:[%s3390_s10 + $0x150] sm:$0xf0] }
  0x56   : > { %1543 = vmatpush.bf16.msrb.mxu2 %v2162_v27  ;;  %v1817_v47 = vadd.f32 %v1816_v33, %v1809_v32  ;;  %v2766_v55 = vor.u32 %v3020_v49, %v2765_v45  ;;  %v2621_v57 = vld [vmem:[%s3390_s10 + $0x440] sm:$0xf]  ;;  %v2984_v58 = vld [vmem:[%s3390_s10 + $0x44c] sm:$0xf0]  ;;  %v2242_v10 = vor.u32 %v2886_v0, %v2239_v1  ;;  %v2850_v12 = vld [vmem:[%s3390_s10 + $0x24] sm:$0xf] }
  0x57   : > { %1813 = vadd.xlane.f32.xlu0 %v1812_v24  ;;  %1556 = vmatpush.bf16.msrb.mxu3 %v2290_v31  ;;  %v2749_v59 = vld [vmem:[%s3390_s10 + $0x540] sm:$0xf]  ;;  %v3016_v61 = vld [vmem:[%s3390_s10 + $0x54c] sm:$0xf0]  ;;  %v2622_v4 = vor.u32 %v2984_v58, %v2621_v57  ;;  %v2095_v13 = vld [vmem:[%s3390_s10 + $0x30] sm:$0xf0] }
  0x58   : > { %1518 = vmatpush.bf16.msrb.mxu0 %v2654_v39  ;;  %v2750_v5 = vor.u32 %v3016_v61, %v2749_v59  ;;  %v2605_v7 = vld [vmem:[%s3390_s10 + $0x420] sm:$0xf]  ;;  %v2980_v8 = vld [vmem:[%s3390_s10 + $0x42c] sm:$0xf0]  ;;  %v2882_v14 = vld [vmem:[%s3390_s10 + $0x124] sm:$0xf]  ;;  %v2098_v20 = vor.u32 %v2850_v12, %v2095_v13 }
  0x59   : > { %1531 = vmatpush.bf16.msrb.mxu1 %v2782_v41  ;;  %v2733_v9 = vld [vmem:[%s3390_s10 + $0x520] sm:$0xf]  ;;  %v3012_v11 = vld [vmem:[%s3390_s10 + $0x52c] sm:$0xf0]  ;;  %v2223_v15 = vld [vmem:[%s3390_s10 + $0x130] sm:$0xf0]  ;;  %v2606_v16 = vor.u32 %v2980_v8, %v2605_v7 }
  0x5a   : > { %1544 = vmatpush.bf16.msrb.mxu2 %v2146_v42  ;;  %v2589_v17 = vld [vmem:[%s3390_s10 + $0x400] sm:$0xf]  ;;  %v2976_v18 = vld [vmem:[%s3390_s10 + $0x40c] sm:$0xf0]  ;;  %v2734_v19 = vor.u32 %v3012_v11, %v2733_v9  ;;  %v2846_v24 = vld [vmem:[%s3390_s10 + $0x4] sm:$0xf]  ;;  %v2226_v25 = vor.u32 %v2882_v14, %v2223_v15 }
  0x5b   : > { %1557 = vmatpush.bf16.msrb.mxu3 %v2274_v48  ;;  %v2717_v21 = vld [vmem:[%s3390_s10 + $0x500] sm:$0xf]  ;;  %v3008_v22 = vld [vmem:[%s3390_s10 + $0x50c] sm:$0xf0]  ;;  %v2079_v26 = vld [vmem:[%s3390_s10 + $0x10] sm:$0xf0]  ;;  %v2590_v32 = vor.u32 %v2976_v18, %v2589_v17 }
  0x5c   : > { %1519 = vmatpush.bf16.msrb.mxu0 %v2638_v54  ;;  %v2878_v27 = vld [vmem:[%s3390_s10 + $0x104] sm:$0xf]  ;;  %v2207_v28 = vld [vmem:[%s3390_s10 + $0x110] sm:$0xf0]  ;;  %v2718_v36 = vor.u32 %v3008_v22, %v2717_v21  ;;  %v2082_v37 = vor.u32 %v2846_v24, %v2079_v26  ;;  %v304_v43 = vld [vmem:[#allocation5 + $0x28] sm:$0xff] }
  0x5d   : > { %1532 = vmatpush.bf16.msrb.mxu1 %v2766_v55  ;;  %v2938_v29 = vld [vmem:[%s3390_s10 + $0x2e4] sm:$0xf]  ;;  %v2447_v30 = vld [vmem:[%s3390_s10 + $0x2f0] sm:$0xf0]  ;;  %v2210_v41 = vor.u32 %v2878_v27, %v2207_v28  ;;  %v3570_v55 = vpack.c.bf16 %v304_v43, %v304_v43 }
  0x5e   : > { %1545 = vmatpush.bf16.msrb.mxu2 %v2130_v56  ;;  %v2970_v31 = vld [vmem:[%s3390_s10 + $0x3e4] sm:$0xf]  ;;  %v2575_v33 = vld [vmem:[%s3390_s10 + $0x3f0] sm:$0xf0]  ;;  %v2450_v42 = vor.u32 %v2938_v29, %v2447_v30 }
  0x5f   : > { %1818 = vadd.xlane.f32.xlu0 %v1817_v47  ;;  %1558 = vmatpush.bf16.msrb.mxu3 %v2258_v60  ;;  %v3002_v34 = vld [vmem:[%s3390_s10 + $0x4e4] sm:$0xf]  ;;  %v2703_v35 = vld [vmem:[%s3390_s10 + $0x4f0] sm:$0xf0]  ;;  %v2578_v44 = vor.u32 %v2970_v31, %v2575_v33 }
  0x60   : > { %1520 = vmatpush.bf16.msrb.mxu0 %v2622_v4  ;;  %v3034_v38 = vld [vmem:[%s3390_s10 + $0x5e4] sm:$0xf]  ;;  %v2831_v39 = vld [vmem:[%s3390_s10 + $0x5f0] sm:$0xf0]  ;;  %v2706_v45 = vor.u32 %v3002_v34, %v2703_v35 }
  0x61   : > { %1533 = vmatpush.bf16.msrb.mxu1 %v2750_v5  ;;  %v303_v40 = vld [vmem:[#allocation5 + $0x20] sm:$0xff]  ;;  %v2934_v47 = vld [vmem:[%s3390_s10 + $0x2c4] sm:$0xf]  ;;  %v2834_v50 = vor.u32 %v3034_v38, %v2831_v39 }
  0x62   : > { %1546 = vmatpush.bf16.msrb.mxu2 %v2114_v6  ;;  %v2431_v48 = vld [vmem:[%s3390_s10 + $0x2d0] sm:$0xf0]  ;;  %v2966_v49 = vld [vmem:[%s3390_s10 + $0x3c4] sm:$0xf]  ;;  %v3565_v51 = vpack.c.bf16 %v303_v40, %v303_v40 }
  0x63   : > { %1559 = vmatpush.bf16.msrb.mxu3 %v2242_v10  ;;  %v2559_v52 = vld [vmem:[%s3390_s10 + $0x3d0] sm:$0xf0]  ;;  %v2998_v53 = vld [vmem:[%s3390_s10 + $0x4c4] sm:$0xf]  ;;  %v2434_v58 = vor.u32 %v2934_v47, %v2431_v48 }
  0x64   : > { %1521 = vmatpush.bf16.msrb.mxu0 %v2606_v16  ;;  %v2687_v54 = vld [vmem:[%s3390_s10 + $0x4d0] sm:$0xf0]  ;;  %v3030_v56 = vld [vmem:[%s3390_s10 + $0x5c4] sm:$0xf]  ;;  %v2562_v59 = vor.u32 %v2966_v49, %v2559_v52 }
  0x65   : > { %1534 = vmatpush.bf16.msrb.mxu1 %v2734_v19  ;;  %v2815_v57 = vld [vmem:[%s3390_s10 + $0x5d0] sm:$0xf0]  ;;  %v2690_v60 = vor.u32 %v2998_v53, %v2687_v54  ;;  %v2930_v61 = vld [vmem:[%s3390_s10 + $0x2a4] sm:$0xf] }
  0x66   : > { %1547 = vmatpush.bf16.msrb.mxu2 %v2098_v20  ;;  %v2415_v62 = vld [vmem:[%s3390_s10 + $0x2b0] sm:$0xf0]  ;;  %v2962_v63 = vld [vmem:[%s3390_s10 + $0x3a4] sm:$0xf]  ;;  %v2818_v0 = vor.u32 %v3030_v56, %v2815_v57 }
  0x67   : > { %1560 = vmatpush.bf16.msrb.mxu3 %v2226_v25  ;;  %v2543_v1 = vld [vmem:[%s3390_s10 + $0x3b0] sm:$0xf0]  ;;  %v2994_v4 = vld [vmem:[%s3390_s10 + $0x4a4] sm:$0xf]  ;;  %v2418_v8 = vor.u32 %v2930_v61, %v2415_v62 }
  0x68   : > { %1522 = vmatpush.bf16.msrb.mxu0 %v2590_v32  ;;  %v2671_v5 = vld [vmem:[%s3390_s10 + $0x4b0] sm:$0xf0]  ;;  %v3026_v6 = vld [vmem:[%s3390_s10 + $0x5a4] sm:$0xf]  ;;  %v2546_v9 = vor.u32 %v2962_v63, %v2543_v1 }
  0x69   : > { %1535 = vmatpush.bf16.msrb.mxu1 %v2718_v36  ;;  %v2799_v7 = vld [vmem:[%s3390_s10 + $0x5b0] sm:$0xf0]  ;;  %v2674_v10 = vor.u32 %v2994_v4, %v2671_v5  ;;  %v2926_v11 = vld [vmem:[%s3390_s10 + $0x284] sm:$0xf] }
  0x6a   : > { %1548 = vmatpush.bf16.msrb.mxu2 %v2082_v37  ;;  %v2399_v12 = vld [vmem:[%s3390_s10 + $0x290] sm:$0xf0]  ;;  %v2958_v13 = vld [vmem:[%s3390_s10 + $0x384] sm:$0xf]  ;;  %v2802_v14 = vor.u32 %v3026_v6, %v2799_v7 }
  0x6b   : > { %1561 = vmatpush.bf16.msrb.mxu3 %v2210_v41  ;;  %1523 = vmatmul.bf16.vlgmr.msrb.gmra.mxu0 %v3565_v51  ;;  %v2527_v15 = vld [vmem:[%s3390_s10 + $0x390] sm:$0xf0]  ;;  %v2990_v16 = vld [vmem:[%s3390_s10 + $0x484] sm:$0xf]  ;;  %v2402_v20 = vor.u32 %v2926_v11, %v2399_v12  ;;  %v2877_v11 = vld [vmem:[%s3390_s10 + $0xf4] sm:$0xf0] }
  0x6c   : > { %1567 = vmatpush.bf16.msra.mxu0 %v2450_v42  ;;  %1536 = vmatmul.bf16.vlgmr.msrb.gmra.mxu1 %v3570_v55  ;;  %v2655_v17 = vld [vmem:[%s3390_s10 + $0x490] sm:$0xf0]  ;;  %v3022_v18 = vld [vmem:[%s3390_s10 + $0x584] sm:$0xf]  ;;  %v2530_v21 = vor.u32 %v2958_v13, %v2527_v15  ;;  %v2325_v12 = vld [vmem:[%s3390_s10 + $0x1e8] sm:$0xf] }
  0x6d   : > { %1580 = vmatpush.bf16.msra.mxu1 %v2578_v44  ;;  %1549 = vmatmul.bf16.vlgmr.msrb.gmra.mxu2 %v3493_v2  ;;  %v2783_v19 = vld [vmem:[%s3390_s10 + $0x590] sm:$0xf0]  ;;  %v2658_v22 = vor.u32 %v2990_v16, %v2655_v17  ;;  %v2922_v24 = vld [vmem:[%s3390_s10 + $0x264] sm:$0xf]  ;;  %v2453_v15 = vld [vmem:[%s3390_s10 + $0x2e8] sm:$0xf] }
  0x6e   : > { %1593 = vmatpush.bf16.msra.mxu2 %v2706_v45  ;;  %1562 = vmatmul.bf16.vlgmr.msrb.gmra.mxu3 %v3495_v3  ;;  %v2383_v25 = vld [vmem:[%s3390_s10 + $0x270] sm:$0xf0]  ;;  %v2954_v26 = vld [vmem:[%s3390_s10 + $0x364] sm:$0xf]  ;;  %v2786_v27 = vor.u32 %v3022_v18, %v2783_v19  ;;  %v2941_v16 = vld [vmem:[%s3390_s10 + $0x2f4] sm:$0xf0] }
  0x6f   : > { %1606 = vmatpush.bf16.msra.mxu3 %v2834_v50  ;;  %v2511_v28 = vld [vmem:[%s3390_s10 + $0x370] sm:$0xf0]  ;;  %v2986_v29 = vld [vmem:[%s3390_s10 + $0x464] sm:$0xf]  ;;  %v2386_v33 = vor.u32 %v2922_v24, %v2383_v25  ;;  %v2581_v19 = vld [vmem:[%s3390_s10 + $0x3e8] sm:$0xf]  ;;  %v2454_v25 = vor.u32 %v2941_v16, %v2453_v15 }
  0x70   : > { %1568 = vmatpush.bf16.msra.mxu0 %v2434_v58  ;;  %v2639_v30 = vld [vmem:[%s3390_s10 + $0x470] sm:$0xf0]  ;;  %v3018_v31 = vld [vmem:[%s3390_s10 + $0x564] sm:$0xf]  ;;  %v2514_v34 = vor.u32 %v2954_v26, %v2511_v28  ;;  %v2181_v26 = vld [vmem:[%s3390_s10 + $0xc8] sm:$0xf] }
  0x71   : > { %1581 = vmatpush.bf16.msra.mxu1 %v2562_v59  ;;  %v2767_v32 = vld [vmem:[%s3390_s10 + $0x570] sm:$0xf0]  ;;  %v2642_v35 = vor.u32 %v2986_v29, %v2639_v30  ;;  %v2918_v36 = vld [vmem:[%s3390_s10 + $0x244] sm:$0xf]  ;;  %v2309_v28 = vld [vmem:[%s3390_s10 + $0x1c8] sm:$0xf] }
  0x72   : > { %1594 = vmatpush.bf16.msra.mxu2 %v2690_v60  ;;  %v2367_v37 = vld [vmem:[%s3390_s10 + $0x250] sm:$0xf0]  ;;  %v2950_v38 = vld [vmem:[%s3390_s10 + $0x344] sm:$0xf]  ;;  %v2770_v39 = vor.u32 %v3018_v31, %v2767_v32  ;;  %v2905_v30 = vld [vmem:[%s3390_s10 + $0x1d4] sm:$0xf0] }
  0x73   : > { %1607 = vmatpush.bf16.msra.mxu3 %v2818_v0  ;;  %v2495_v40 = vld [vmem:[%s3390_s10 + $0x350] sm:$0xf0]  ;;  %v2982_v41 = vld [vmem:[%s3390_s10 + $0x444] sm:$0xf]  ;;  %v2370_v45 = vor.u32 %v2918_v36, %v2367_v37  ;;  %v2437_v31 = vld [vmem:[%s3390_s10 + $0x2c8] sm:$0xf]  ;;  %v2310_v36 = vor.u32 %v2905_v30, %v2309_v28 }
  0x74   : > { %1569 = vmatpush.bf16.msra.mxu0 %v2418_v8  ;;  %v2623_v42 = vld [vmem:[%s3390_s10 + $0x450] sm:$0xf0]  ;;  %v3014_v43 = vld [vmem:[%s3390_s10 + $0x544] sm:$0xf]  ;;  %v2498_v47 = vor.u32 %v2950_v38, %v2495_v40  ;;  %v2937_v32 = vld [vmem:[%s3390_s10 + $0x2d4] sm:$0xf0] }
  0x75   : > { %1582 = vmatpush.bf16.msra.mxu1 %v2546_v9  ;;  %v2751_v44 = vld [vmem:[%s3390_s10 + $0x550] sm:$0xf0]  ;;  %v2626_v48 = vor.u32 %v2982_v41, %v2623_v42  ;;  %v2914_v49 = vld [vmem:[%s3390_s10 + $0x224] sm:$0xf]  ;;  %v2438_v37 = vor.u32 %v2937_v32, %v2437_v31  ;;  %v2165_v38 = vld [vmem:[%s3390_s10 + $0xa8] sm:$0xf] }
  0x76   : > { %1595 = vmatpush.bf16.msra.mxu2 %v2674_v10  ;;  %v2351_v50 = vld [vmem:[%s3390_s10 + $0x230] sm:$0xf0]  ;;  %v2946_v52 = vld [vmem:[%s3390_s10 + $0x324] sm:$0xf]  ;;  %v2754_v53 = vor.u32 %v3014_v43, %v2751_v44  ;;  %v2197_v10 = vld [vmem:[%s3390_s10 + $0xe8] sm:$0xf] }
  0x77   : > { %1608 = vmatpush.bf16.msra.mxu3 %v2802_v14  ;;  %v2479_v54 = vld [vmem:[%s3390_s10 + $0x330] sm:$0xf0]  ;;  %v2978_v56 = vld [vmem:[%s3390_s10 + $0x424] sm:$0xf]  ;;  %v2354_v60 = vor.u32 %v2914_v49, %v2351_v50  ;;  %v2909_v14 = vld [vmem:[%s3390_s10 + $0x1f4] sm:$0xf0] }
  0x78   : > { %1570 = vmatpush.bf16.msra.mxu0 %v2402_v20  ;;  %v2607_v57 = vld [vmem:[%s3390_s10 + $0x430] sm:$0xf0]  ;;  %v3010_v58 = vld [vmem:[%s3390_s10 + $0x524] sm:$0xf]  ;;  %v2482_v63 = vor.u32 %v2946_v52, %v2479_v54  ;;  %v2973_v20 = vld [vmem:[%s3390_s10 + $0x3f4] sm:$0xf0]  ;;  %v2326_v24 = vor.u32 %v2909_v14, %v2325_v12 }
  0x79   : > { %1583 = vmatpush.bf16.msra.mxu1 %v2530_v21  ;;  %v2735_v59 = vld [vmem:[%s3390_s10 + $0x530] sm:$0xf0]  ;;  %v2910_v61 = vld [vmem:[%s3390_s10 + $0x204] sm:$0xf]  ;;  %v2610_v0 = vor.u32 %v2978_v56, %v2607_v57  ;;  %v2582_v29 = vor.u32 %v2973_v20, %v2581_v19  ;;  %v2293_v40 = vld [vmem:[%s3390_s10 + $0x1a8] sm:$0xf] }
  0x7a   : > { %1596 = vmatpush.bf16.msra.mxu2 %v2658_v22  ;;  %v2335_v62 = vld [vmem:[%s3390_s10 + $0x210] sm:$0xf0]  ;;  %v2942_v1 = vld [vmem:[%s3390_s10 + $0x304] sm:$0xf]  ;;  %v2738_v6 = vor.u32 %v3010_v58, %v2735_v59  ;;  %v2198_v22 = vor.u32 %v2877_v11, %v2197_v10  ;;  %v2901_v42 = vld [vmem:[%s3390_s10 + $0x1b4] sm:$0xf0] }
  0x7b   : > { %1609 = vmatpush.bf16.msra.mxu3 %v2786_v27  ;;  %v2463_v4 = vld [vmem:[%s3390_s10 + $0x310] sm:$0xf0]  ;;  %v2974_v5 = vld [vmem:[%s3390_s10 + $0x404] sm:$0xf]  ;;  %v2338_v13 = vor.u32 %v2910_v61, %v2335_v62  ;;  %v2873_v27 = vld [vmem:[%s3390_s10 + $0xd4] sm:$0xf0]  ;;  %v2294_v49 = vor.u32 %v2901_v42, %v2293_v40 }
  0x7c   : > { %1571 = vmatpush.bf16.msra.mxu0 %v2386_v33  ;;  %v2591_v7 = vld [vmem:[%s3390_s10 + $0x410] sm:$0xf0]  ;;  %v3006_v8 = vld [vmem:[%s3390_s10 + $0x504] sm:$0xf]  ;;  %v2466_v17 = vor.u32 %v2942_v1, %v2463_v4  ;;  %v2565_v33 = vld [vmem:[%s3390_s10 + $0x3c8] sm:$0xf] }
  0x7d   : > { %1584 = vmatpush.bf16.msra.mxu1 %v2514_v34  ;;  %v2719_v9 = vld [vmem:[%s3390_s10 + $0x510] sm:$0xf0]  ;;  %v2594_v18 = vor.u32 %v2974_v5, %v2591_v7  ;;  %v2969_v34 = vld [vmem:[%s3390_s10 + $0x3d4] sm:$0xf0]  ;;  %v2421_v43 = vld [vmem:[%s3390_s10 + $0x2a8] sm:$0xf] }
  0x7e   : > { %1597 = vmatpush.bf16.msra.mxu2 %v2642_v35  ;;  %v2722_v21 = vor.u32 %v3006_v8, %v2719_v9  ;;  %v2182_v35 = vor.u32 %v2873_v27, %v2181_v26  ;;  %v2566_v41 = vor.u32 %v2969_v34, %v2565_v33  ;;  %v2933_v44 = vld [vmem:[%s3390_s10 + $0x2b4] sm:$0xf0]  ;;  %v2149_v52 = vld [vmem:[%s3390_s10 + $0x88] sm:$0xf] }
  0x7f   : > { %1610 = vmatpush.bf16.msra.mxu3 %v2770_v39  ;;  %v2869_v39 = vld [vmem:[%s3390_s10 + $0xb4] sm:$0xf0]  ;;  %v2422_v50 = vor.u32 %v2933_v44, %v2421_v43  ;;  %v2277_v54 = vld [vmem:[%s3390_s10 + $0x188] sm:$0xf] }
  0x80   : > { %1572 = vmatpush.bf16.msra.mxu0 %v2370_v45  ;;  %v2549_v45 = vld [vmem:[%s3390_s10 + $0x3a8] sm:$0xf]  ;;  %v2897_v57 = vld [vmem:[%s3390_s10 + $0x194] sm:$0xf0] }
  0x81   : > { %1585 = vmatpush.bf16.msra.mxu1 %v2498_v47  ;;  %v2965_v47 = vld [vmem:[%s3390_s10 + $0x3b4] sm:$0xf0]  ;;  %v2405_v58 = vld [vmem:[%s3390_s10 + $0x288] sm:$0xf] }
  0x82   : > { %1598 = vmatpush.bf16.msra.mxu2 %v2626_v48  ;;  %v2166_v48 = vor.u32 %v2869_v39, %v2165_v38  ;;  %v2550_v56 = vor.u32 %v2965_v47, %v2549_v45  ;;  %v2929_v59 = vld [vmem:[%s3390_s10 + $0x294] sm:$0xf0]  ;;  %v2133_v1 = vld [vmem:[%s3390_s10 + $0x68] sm:$0xf] }
  0x83   : > { %1611 = vmatpush.bf16.msra.mxu3 %v2754_v53  ;;  %v2865_v53 = vld [vmem:[%s3390_s10 + $0x94] sm:$0xf0]  ;;  %v2261_v5 = vld [vmem:[%s3390_s10 + $0x168] sm:$0xf] }
  0x84   : > { %1573 = vmatpush.bf16.msra.mxu0 %v2354_v60  ;;  %v2533_v60 = vld [vmem:[%s3390_s10 + $0x388] sm:$0xf]  ;;  %v2961_v61 = vld [vmem:[%s3390_s10 + $0x394] sm:$0xf0]  ;;  %v2150_v62 = vor.u32 %v2865_v53, %v2149_v52 }
  0x85   : > { %1586 = vmatpush.bf16.msra.mxu1 %v2482_v63  ;;  %v2278_v63 = vor.u32 %v2897_v57, %v2277_v54  ;;  %v2861_v4 = vld [vmem:[%s3390_s10 + $0x74] sm:$0xf0]  ;;  %v2389_v8 = vld [vmem:[%s3390_s10 + $0x268] sm:$0xf]  ;;  %v2875_v57 = vld [vmem:[%s3390_s10 + $0xec] sm:$0xf] }
  0x86   : > { %1599 = vmatpush.bf16.msra.mxu2 %v2610_v0  ;;  %v2406_v0 = vor.u32 %v2929_v59, %v2405_v58  ;;  %v2893_v7 = vld [vmem:[%s3390_s10 + $0x174] sm:$0xf0]  ;;  %v2517_v10 = vld [vmem:[%s3390_s10 + $0x368] sm:$0xf]  ;;  %v2134_v12 = vor.u32 %v2861_v4, %v2133_v1  ;;  %v2199_v58 = vld [vmem:[%s3390_s10 + $0xf8] sm:$0xf0] }
  0x87   : > { %1612 = vmatpush.bf16.msra.mxu3 %v2738_v6  ;;  %v2534_v6 = vor.u32 %v2961_v61, %v2533_v60  ;;  %v2925_v9 = vld [vmem:[%s3390_s10 + $0x274] sm:$0xf0]  ;;  %v2117_v15 = vld [vmem:[%s3390_s10 + $0x48] sm:$0xf]  ;;  %v2907_v61 = vld [vmem:[%s3390_s10 + $0x1ec] sm:$0xf]  ;;  %v2202_v4 = vor.u32 %v2875_v57, %v2199_v58 }
  0x88   : > { %1574 = vmatpush.bf16.msra.mxu0 %v2338_v13  ;;  %v2957_v11 = vld [vmem:[%s3390_s10 + $0x374] sm:$0xf0]  ;;  %v2262_v13 = vor.u32 %v2893_v7, %v2261_v5  ;;  %v2390_v14 = vor.u32 %v2925_v9, %v2389_v8  ;;  %v2373_v20 = vld [vmem:[%s3390_s10 + $0x248] sm:$0xf] }
  0x89   : > { %1587 = vmatpush.bf16.msra.mxu1 %v2466_v17  ;;  %v2857_v16 = vld [vmem:[%s3390_s10 + $0x54] sm:$0xf0]  ;;  %v2245_v17 = vld [vmem:[%s3390_s10 + $0x148] sm:$0xf] }
  0x8a   : > { %1600 = vmatpush.bf16.msra.mxu2 %v2594_v18  ;;  %v2518_v18 = vor.u32 %v2957_v11, %v2517_v10  ;;  %v2889_v19 = vld [vmem:[%s3390_s10 + $0x154] sm:$0xf0]  ;;  %v2101_v28 = vld [vmem:[%s3390_s10 + $0x28] sm:$0xf]  ;;  %v2871_v10 = vld [vmem:[%s3390_s10 + $0xcc] sm:$0xf] }
  0x8b   : > { %1613 = vmatpush.bf16.msra.mxu3 %v2722_v21  ;;  %1575 = vmatmul.bf16.vlgmr.msra.gmra.mxu0 %v3508_v23  ;;  %v2921_v21 = vld [vmem:[%s3390_s10 + $0x254] sm:$0xf0]  ;;  %v2246_v26 = vor.u32 %v2889_v19, %v2245_v17  ;;  %v2229_v30 = vld [vmem:[%s3390_s10 + $0x128] sm:$0xf]  ;;  %v2183_v11 = vld [vmem:[%s3390_s10 + $0xd8] sm:$0xf0] }
  0x8c   : > { %1619 = vmatpush.bf16.msrb.mxu0 %v2198_v22  ;;  %1588 = vmatmul.bf16.vlgmr.msra.gmra.mxu1 %v3522_v46  ;;  %v2501_v22 = vld [vmem:[%s3390_s10 + $0x348] sm:$0xf]  ;;  %v2374_v27 = vor.u32 %v2921_v21, %v2373_v20  ;;  %v2885_v32 = vld [vmem:[%s3390_s10 + $0x134] sm:$0xf0] }
  0x8d   : > { %1632 = vmatpush.bf16.msrb.mxu1 %v2326_v24  ;;  %1601 = vmatmul.bf16.vlgmr.msra.gmra.mxu2 %v3565_v51  ;;  %v2953_v24 = vld [vmem:[%s3390_s10 + $0x354] sm:$0xf0]  ;;  %v2357_v33 = vld [vmem:[%s3390_s10 + $0x228] sm:$0xf]  ;;  %v2230_v40 = vor.u32 %v2885_v32, %v2229_v30 }
  0x8e   : > { %1645 = vmatpush.bf16.msrb.mxu2 %v2454_v25  ;;  %1614 = vmatmul.bf16.vlgmr.msra.gmra.mxu3 %v3570_v55  ;;  %v2118_v25 = vor.u32 %v2857_v16, %v2117_v15  ;;  %v2502_v31 = vor.u32 %v2953_v24, %v2501_v22  ;;  %v2917_v34 = vld [vmem:[%s3390_s10 + $0x234] sm:$0xf0]  ;;  %v2085_v38 = vld [vmem:[%s3390_s10 + $0x8] sm:$0xf]  ;;  %v2186_v16 = vor.u32 %v2871_v10, %v2183_v11  ;;  %v2867_v22 = vld [vmem:[%s3390_s10 + $0xac] sm:$0xf] }
  0x8f   : > { %1658 = vmatpush.bf16.msrb.mxu3 %v2582_v29  ;;  %v2853_v29 = vld [vmem:[%s3390_s10 + $0x34] sm:$0xf0]  ;;  %v2213_v42 = vld [vmem:[%s3390_s10 + $0x108] sm:$0xf]  ;;  %v2167_v24 = vld [vmem:[%s3390_s10 + $0xb8] sm:$0xf0] }
  0x90   : > { %1620 = vmatpush.bf16.msrb.mxu0 %v2182_v35  ;;  %v2485_v35 = vld [vmem:[%s3390_s10 + $0x328] sm:$0xf]  ;;  %v2849_v39 = vld [vmem:[%s3390_s10 + $0x14] sm:$0xf0] }
  0x91   : > { %1633 = vmatpush.bf16.msrb.mxu1 %v2310_v36  ;;  %v2949_v36 = vld [vmem:[%s3390_s10 + $0x334] sm:$0xf0]  ;;  %v2341_v44 = vld [vmem:[%s3390_s10 + $0x208] sm:$0xf]  ;;  %v2086_v54 = vor.u32 %v2849_v39, %v2085_v38  ;;  %v2279_v38 = vld [vmem:[%s3390_s10 + $0x198] sm:$0xf0] }
  0x92   : > { %1646 = vmatpush.bf16.msrb.mxu2 %v2438_v37  ;;  %v2102_v37 = vor.u32 %v2853_v29, %v2101_v28  ;;  %v2881_v43 = vld [vmem:[%s3390_s10 + $0x114] sm:$0xf0]  ;;  %v2486_v45 = vor.u32 %v2949_v36, %v2485_v35  ;;  %v2837_v53 = vld [vmem:[%s3390_s10 + $0x5e8] sm:$0xf]  ;;  %v2170_v29 = vor.u32 %v2867_v22, %v2167_v24  ;;  %v2863_v35 = vld [vmem:[%s3390_s10 + $0x8c] sm:$0xf] }
  0x93   : > { %1659 = vmatpush.bf16.msrb.mxu3 %v2566_v41  ;;  %v2358_v41 = vor.u32 %v2917_v34, %v2357_v33  ;;  %v2913_v47 = vld [vmem:[%s3390_s10 + $0x214] sm:$0xf0]  ;;  %v2214_v59 = vor.u32 %v2881_v43, %v2213_v42  ;;  %v2693_v5 = vld [vmem:[%s3390_s10 + $0x4c8] sm:$0xf]  ;;  %v2151_v36 = vld [vmem:[%s3390_s10 + $0x98] sm:$0xf0] }
  0x94   : > { %1621 = vmatpush.bf16.msrb.mxu0 %v2166_v48  ;;  %v2469_v48 = vld [vmem:[%s3390_s10 + $0x308] sm:$0xf]  ;;  %v3005_v52 = vld [vmem:[%s3390_s10 + $0x4f4] sm:$0xf0]  ;;  %v2342_v60 = vor.u32 %v2913_v47, %v2341_v44  ;;  %v2847_v24 = vld [vmem:[%s3390_s10 + $0xc] sm:$0xf] }
  0x95   : > { %1634 = vmatpush.bf16.msrb.mxu1 %v2294_v49  ;;  %v2945_v49 = vld [vmem:[%s3390_s10 + $0x314] sm:$0xf0]  ;;  %v2821_v7 = vld [vmem:[%s3390_s10 + $0x5c8] sm:$0xf] }
  0x96   : > { %1647 = vmatpush.bf16.msrb.mxu2 %v2422_v50  ;;  %v2709_v50 = vld [vmem:[%s3390_s10 + $0x4e8] sm:$0xf]  ;;  %v3033_v9 = vld [vmem:[%s3390_s10 + $0x5d4] sm:$0xf0] }
  0x97   : > { %1660 = vmatpush.bf16.msrb.mxu3 %v2550_v56  ;;  %v3037_v56 = vld [vmem:[%s3390_s10 + $0x5f4] sm:$0xf0]  ;;  %v2822_v15 = vor.u32 %v3033_v9, %v2821_v7  ;;  %v2677_v17 = vld [vmem:[%s3390_s10 + $0x4a8] sm:$0xf] }
  0x98   : > { %1622 = vmatpush.bf16.msrb.mxu0 %v2150_v62  ;;  %v2327_v62 = vld [vmem:[%s3390_s10 + $0x1f8] sm:$0xf0]  ;;  %v2838_v1 = vor.u32 %v3037_v56, %v2837_v53  ;;  %v2805_v19 = vld [vmem:[%s3390_s10 + $0x5a8] sm:$0xf]  ;;  %v3029_v21 = vld [vmem:[%s3390_s10 + $0x5b4] sm:$0xf0] }
  0x99   : > { %1635 = vmatpush.bf16.msrb.mxu1 %v2278_v63  ;;  %v2470_v63 = vor.u32 %v2945_v49, %v2469_v48  ;;  %v2330_v8 = vor.u32 %v2907_v61, %v2327_v62  ;;  %v2806_v28 = vor.u32 %v3029_v21, %v2805_v19  ;;  %v2661_v30 = vld [vmem:[%s3390_s10 + $0x488] sm:$0xf]  ;;  %v3025_v34 = vld [vmem:[%s3390_s10 + $0x594] sm:$0xf0]  ;;  %v2859_v48 = vld [vmem:[%s3390_s10 + $0x6c] sm:$0xf] }
  0x9a   : > { %1648 = vmatpush.bf16.msrb.mxu2 %v2406_v0  ;;  %v2710_v0 = vor.u32 %v3005_v52, %v2709_v50  ;;  %v2789_v32 = vld [vmem:[%s3390_s10 + $0x588] sm:$0xf]  ;;  %v2989_v43 = vld [vmem:[%s3390_s10 + $0x474] sm:$0xf0]  ;;  %v2135_v49 = vld [vmem:[%s3390_s10 + $0x78] sm:$0xf0] }
  0x9b   : > { %1661 = vmatpush.bf16.msrb.mxu3 %v2534_v6  ;;  %v3001_v6 = vld [vmem:[%s3390_s10 + $0x4d4] sm:$0xf0]  ;;  %v2645_v42 = vld [vmem:[%s3390_s10 + $0x468] sm:$0xf]  ;;  %v2891_v50 = vld [vmem:[%s3390_s10 + $0x16c] sm:$0xf]  ;;  %v2138_v56 = vor.u32 %v2859_v48, %v2135_v49 }
  0x9c   : > { %1623 = vmatpush.bf16.msrb.mxu0 %v2134_v12  ;;  %v2903_v12 = vld [vmem:[%s3390_s10 + $0x1cc] sm:$0xf]  ;;  %v2773_v44 = vld [vmem:[%s3390_s10 + $0x568] sm:$0xf]  ;;  %v3021_v47 = vld [vmem:[%s3390_s10 + $0x574] sm:$0xf0]  ;;  %v2646_v53 = vor.u32 %v2989_v43, %v2645_v42 }
  0x9d   : > { %1636 = vmatpush.bf16.msrb.mxu1 %v2262_v13  ;;  %v2311_v13 = vld [vmem:[%s3390_s10 + $0x1d8] sm:$0xf0]  ;;  %v2629_v57 = vld [vmem:[%s3390_s10 + $0x448] sm:$0xf]  ;;  %v2985_v58 = vld [vmem:[%s3390_s10 + $0x454] sm:$0xf0] }
  0x9e   : > { %1649 = vmatpush.bf16.msrb.mxu2 %v2390_v14  ;;  %v2694_v14 = vor.u32 %v3001_v6, %v2693_v5  ;;  %v2314_v20 = vor.u32 %v2903_v12, %v2311_v13  ;;  %v2263_v52 = vld [vmem:[%s3390_s10 + $0x178] sm:$0xf0]  ;;  %v3017_v61 = vld [vmem:[%s3390_s10 + $0x554] sm:$0xf0]  ;;  %v2855_v62 = vld [vmem:[%s3390_s10 + $0x4c] sm:$0xf] }
  0x9f   : > { %1662 = vmatpush.bf16.msrb.mxu3 %v2518_v18  ;;  %v2997_v18 = vld [vmem:[%s3390_s10 + $0x4b4] sm:$0xf0]  ;;  %v2613_v7 = vld [vmem:[%s3390_s10 + $0x428] sm:$0xf]  ;;  %v2851_v12 = vld [vmem:[%s3390_s10 + $0x2c] sm:$0xf] }
  0xa0   : > { %1624 = vmatpush.bf16.msrb.mxu0 %v2118_v25  ;;  %v2899_v25 = vld [vmem:[%s3390_s10 + $0x1ac] sm:$0xf]  ;;  %v2741_v9 = vld [vmem:[%s3390_s10 + $0x528] sm:$0xf]  ;;  %v3013_v11 = vld [vmem:[%s3390_s10 + $0x534] sm:$0xf0] }
  0xa1   : > { %1637 = vmatpush.bf16.msrb.mxu1 %v2246_v26  ;;  %v2295_v26 = vld [vmem:[%s3390_s10 + $0x1b8] sm:$0xf0]  ;;  %v2742_v19 = vor.u32 %v3013_v11, %v2741_v9  ;;  %v2725_v21 = vld [vmem:[%s3390_s10 + $0x508] sm:$0xf]  ;;  %v3009_v22 = vld [vmem:[%s3390_s10 + $0x514] sm:$0xf0] }
  0xa2   : > { %1650 = vmatpush.bf16.msrb.mxu2 %v2374_v27  ;;  %v2678_v27 = vor.u32 %v2997_v18, %v2677_v17  ;;  %v2298_v33 = vor.u32 %v2899_v25, %v2295_v26  ;;  %v2103_v13 = vld [vmem:[%s3390_s10 + $0x38] sm:$0xf0]  ;;  %v2597_v17 = vld [vmem:[%s3390_s10 + $0x408] sm:$0xf]  ;;  %v2977_v18 = vld [vmem:[%s3390_s10 + $0x414] sm:$0xf0] }
  0xa3   : > { %1663 = vmatpush.bf16.msrb.mxu3 %v2502_v31  ;;  %v2993_v31 = vld [vmem:[%s3390_s10 + $0x494] sm:$0xf0]  ;;  %v2087_v26 = vld [vmem:[%s3390_s10 + $0x18] sm:$0xf0] }
  0xa4   : > { %1625 = vmatpush.bf16.msrb.mxu0 %v2102_v37  ;;  %v2895_v37 = vld [vmem:[%s3390_s10 + $0x18c] sm:$0xf]  ;;  %v2662_v39 = vor.u32 %v2993_v31, %v2661_v30  ;;  %v2455_v30 = vld [vmem:[%s3390_s10 + $0x2f8] sm:$0xf0] }
  0xa5   : > { %1638 = vmatpush.bf16.msrb.mxu1 %v2230_v40  ;;  %v2790_v40 = vor.u32 %v3025_v34, %v2789_v32  ;;  %v2971_v31 = vld [vmem:[%s3390_s10 + $0x3ec] sm:$0xf]  ;;  %v2598_v32 = vor.u32 %v2977_v18, %v2597_v17  ;;  %v2567_v49 = vld [vmem:[%s3390_s10 + $0x3d8] sm:$0xf0] }
  0xa6   : > { %1651 = vmatpush.bf16.msrb.mxu2 %v2358_v41  ;;  %v2154_v41 = vor.u32 %v2863_v35, %v2151_v36  ;;  %v3003_v34 = vld [vmem:[%s3390_s10 + $0x4ec] sm:$0xf]  ;;  %v2711_v35 = vld [vmem:[%s3390_s10 + $0x4f8] sm:$0xf0]  ;;  %v2726_v36 = vor.u32 %v3009_v22, %v2725_v21 }
  0xa7   : > { %1664 = vmatpush.bf16.msrb.mxu3 %v2486_v45  ;;  %v2282_v45 = vor.u32 %v2895_v37, %v2279_v38  ;;  %v2090_v37 = vor.u32 %v2847_v24, %v2087_v26  ;;  %v3035_v38 = vld [vmem:[%s3390_s10 + $0x5ec] sm:$0xf]  ;;  %v2714_v43 = vor.u32 %v3003_v34, %v2711_v35  ;;  %v2407_v11 = vld [vmem:[%s3390_s10 + $0x298] sm:$0xf0] }
  0xa8   : > { %1626 = vmatpush.bf16.msrb.mxu0 %v2086_v54  ;;  %v2774_v54 = vor.u32 %v3021_v47, %v2773_v44  ;;  %v2935_v44 = vld [vmem:[%s3390_s10 + $0x2cc] sm:$0xf]  ;;  %v2791_v18 = vld [vmem:[%s3390_s10 + $0x598] sm:$0xf0] }
  0xa9   : > { %1639 = vmatpush.bf16.msrb.mxu1 %v2214_v59  ;;  %v2757_v59 = vld [vmem:[%s3390_s10 + $0x548] sm:$0xf]  ;;  %v2967_v47 = vld [vmem:[%s3390_s10 + $0x3cc] sm:$0xf]  ;;  %v2391_v26 = vld [vmem:[%s3390_s10 + $0x278] sm:$0xf0] }
  0xaa   : > { %1652 = vmatpush.bf16.msrb.mxu2 %v2342_v60  ;;  %v2266_v60 = vor.u32 %v2891_v50, %v2263_v52  ;;  %v2758_v5 = vor.u32 %v3017_v61, %v2757_v59  ;;  %v2999_v50 = vld [vmem:[%s3390_s10 + $0x4cc] sm:$0xf]  ;;  %v2695_v52 = vld [vmem:[%s3390_s10 + $0x4d8] sm:$0xf0]  ;;  %v2570_v59 = vor.u32 %v2967_v47, %v2567_v49 }
  0xab   : > { %1665 = vmatpush.bf16.msrb.mxu3 %v2470_v63  ;;  %1627 = vmatmul.bf16.vlgmr.msrb.gmra.mxu0 %v3493_v2  ;;  %v2119_v63 = vld [vmem:[%s3390_s10 + $0x58] sm:$0xf0]  ;;  %v3023_v17 = vld [vmem:[%s3390_s10 + $0x58c] sm:$0xf] }
  0xac   : > { %1671 = vmatpush.bf16.msra.mxu0 %v2710_v0  ;;  %1640 = vmatmul.bf16.vlgmr.msrb.gmra.mxu1 %v3495_v3  ;;  %v2887_v0 = vld [vmem:[%s3390_s10 + $0x14c] sm:$0xf]  ;;  %v2122_v6 = vor.u32 %v2855_v62, %v2119_v63  ;;  %v2423_v61 = vld [vmem:[%s3390_s10 + $0x2b8] sm:$0xf0] }
  0xad   : > { %1684 = vmatpush.bf16.msra.mxu1 %v2838_v1  ;;  %1653 = vmatmul.bf16.vlgmr.msrb.gmra.mxu2 %v3508_v23  ;;  %v2247_v1 = vld [vmem:[%s3390_s10 + $0x158] sm:$0xf0]  ;;  %v2963_v62 = vld [vmem:[%s3390_s10 + $0x3ac] sm:$0xf] }
  0xae   : > { %1697 = vmatpush.bf16.msra.mxu2 %v2202_v4  ;;  %1666 = vmatmul.bf16.vlgmr.msrb.gmra.mxu3 %v3522_v46  ;;  %v2630_v4 = vor.u32 %v2985_v58, %v2629_v57  ;;  %v2250_v10 = vor.u32 %v2887_v0, %v2247_v1  ;;  %v2931_v57 = vld [vmem:[%s3390_s10 + $0x2ac] sm:$0xf]  ;;  %v2551_v63 = vld [vmem:[%s3390_s10 + $0x3b8] sm:$0xf0] }
  0xaf   : > { %1710 = vmatpush.bf16.msra.mxu3 %v2330_v8  ;;  %v2981_v8 = vld [vmem:[%s3390_s10 + $0x434] sm:$0xf0]  ;;  %v2554_v9 = vor.u32 %v2963_v62, %v2551_v63  ;;  %v3019_v35 = vld [vmem:[%s3390_s10 + $0x56c] sm:$0xf]  ;;  %v2487_v63 = vld [vmem:[%s3390_s10 + $0x338] sm:$0xf0] }
  0xb0   : > { %1672 = vmatpush.bf16.msra.mxu0 %v2694_v14  ;;  %v2883_v14 = vld [vmem:[%s3390_s10 + $0x12c] sm:$0xf] }
  0xb1   : > { %1685 = vmatpush.bf16.msra.mxu1 %v2822_v15  ;;  %v2231_v15 = vld [vmem:[%s3390_s10 + $0x138] sm:$0xf0]  ;;  %v2983_v47 = vld [vmem:[%s3390_s10 + $0x44c] sm:$0xf] }
  0xb2   : > { %1698 = vmatpush.bf16.msra.mxu2 %v2186_v16  ;;  %v2614_v16 = vor.u32 %v2981_v8, %v2613_v7  ;;  %v2234_v25 = vor.u32 %v2883_v14, %v2231_v15  ;;  %v2807_v7 = vld [vmem:[%s3390_s10 + $0x5b8] sm:$0xf0]  ;;  %v2426_v8 = vor.u32 %v2931_v57, %v2423_v61  ;;  %v2991_v15 = vld [vmem:[%s3390_s10 + $0x48c] sm:$0xf] }
  0xb3   : > { %1711 = vmatpush.bf16.msra.mxu3 %v2314_v20  ;;  %v2106_v20 = vor.u32 %v2851_v12, %v2103_v13  ;;  %v2959_v12 = vld [vmem:[%s3390_s10 + $0x38c] sm:$0xf]  ;;  %v2535_v14 = vld [vmem:[%s3390_s10 + $0x398] sm:$0xf0] }
  0xb4   : > { %1673 = vmatpush.bf16.msra.mxu0 %v2678_v27  ;;  %v2879_v27 = vld [vmem:[%s3390_s10 + $0x10c] sm:$0xf]  ;;  %v2538_v24 = vor.u32 %v2959_v12, %v2535_v14  ;;  %v2743_v12 = vld [vmem:[%s3390_s10 + $0x538] sm:$0xf0]  ;;  %v1846_v14 = vstv %s1845_s21 }
  0xb5   : > { %1686 = vmatpush.bf16.msra.mxu1 %v2806_v28  ;;  %v2215_v28 = vld [vmem:[%s3390_s10 + $0x118] sm:$0xf0]  ;;  %v2947_v62 = vld [vmem:[%s3390_s10 + $0x32c] sm:$0xf] }
  0xb6   : > { %1699 = vmatpush.bf16.msra.mxu2 %v2170_v29  ;;  %v2939_v29 = vld [vmem:[%s3390_s10 + $0x2ec] sm:$0xf] }
  0xb7   : > { %1712 = vmatpush.bf16.msra.mxu3 %v2298_v33  ;;  %v2583_v33 = vld [vmem:[%s3390_s10 + $0x3f8] sm:$0xf0] }
  0xb8   : > { %1674 = vmatpush.bf16.msra.mxu0 %v2662_v39  ;;  %v2839_v39 = vld [vmem:[%s3390_s10 + $0x5f8] sm:$0xf0]  ;;  %v2586_v42 = vor.u32 %v2971_v31, %v2583_v33  ;;  %v2794_v31 = vor.u32 %v3023_v17, %v2791_v18  ;;  %v2911_v18 = vld [vmem:[%s3390_s10 + $0x20c] sm:$0xf] }
  0xb9   : > { %1687 = vmatpush.bf16.msra.mxu1 %v2790_v40  ;;  %v2218_v40 = vor.u32 %v2879_v27, %v2215_v28  ;;  %v2842_v48 = vor.u32 %v3035_v38, %v2839_v39  ;;  %v2955_v27 = vld [vmem:[%s3390_s10 + $0x36c] sm:$0xf]  ;;  %v2519_v28 = vld [vmem:[%s3390_s10 + $0x378] sm:$0xf0] }
  0xba   : > { %1700 = vmatpush.bf16.msra.mxu2 %v2154_v41  ;;  %v2458_v41 = vor.u32 %v2939_v29, %v2455_v30  ;;  %v2647_v33 = vld [vmem:[%s3390_s10 + $0x478] sm:$0xf0]  ;;  %v2522_v39 = vor.u32 %v2955_v27, %v2519_v28 }
  0xbb   : > { %1713 = vmatpush.bf16.msra.mxu3 %v2282_v45  ;;  %v2439_v45 = vld [vmem:[%s3390_s10 + $0x2d8] sm:$0xf0] }
  0xbc   : > { %1675 = vmatpush.bf16.msra.mxu0 %v2646_v53  ;;  %v3031_v53 = vld [vmem:[%s3390_s10 + $0x5cc] sm:$0xf]  ;;  %v2599_v27 = vld [vmem:[%s3390_s10 + $0x418] sm:$0xf0] }
  0xbd   : > { %1688 = vmatpush.bf16.msra.mxu1 %v2774_v54  ;;  %v2823_v54 = vld [vmem:[%s3390_s10 + $0x5d8] sm:$0xf0] }
  0xbe   : > { %1701 = vmatpush.bf16.msra.mxu2 %v2138_v56  ;;  %v2442_v56 = vor.u32 %v2935_v44, %v2439_v45  ;;  %v2826_v1 = vor.u32 %v3031_v53, %v2823_v54  ;;  %v2503_v45 = vld [vmem:[%s3390_s10 + $0x358] sm:$0xf0]  ;;  %v2915_v54 = vld [vmem:[%s3390_s10 + $0x22c] sm:$0xf] }
  0xbf   : > { %1714 = vmatpush.bf16.msra.mxu3 %v2266_v60  ;;  %v2698_v60 = vor.u32 %v2999_v50, %v2695_v52  ;;  %v3015_v50 = vld [vmem:[%s3390_s10 + $0x54c] sm:$0xf]  ;;  %v2759_v52 = vld [vmem:[%s3390_s10 + $0x558] sm:$0xf0] }
  0xc0   : > { %1676 = vmatpush.bf16.msra.mxu0 %v2630_v4  ;;  %v2995_v4 = vld [vmem:[%s3390_s10 + $0x4ac] sm:$0xf] }
  0xc1   : > { %1689 = vmatpush.bf16.msra.mxu1 %v2758_v5  ;;  %v2679_v5 = vld [vmem:[%s3390_s10 + $0x4b8] sm:$0xf0] }
  0xc2   : > { %1702 = vmatpush.bf16.msra.mxu2 %v2122_v6  ;;  %v3027_v6 = vld [vmem:[%s3390_s10 + $0x5ac] sm:$0xf] }
  0xc3   : > { %1715 = vmatpush.bf16.msra.mxu3 %v2250_v10  ;;  %v2682_v10 = vor.u32 %v2995_v4, %v2679_v5  ;;  %v2810_v13 = vor.u32 %v3027_v6, %v2807_v7  ;;  %v2762_v5 = vor.u32 %v3015_v50, %v2759_v52  ;;  %v2979_v6 = vld [vmem:[%s3390_s10 + $0x42c] sm:$0xf]  ;;  %v2615_v7 = vld [vmem:[%s3390_s10 + $0x438] sm:$0xf0]  ;;  %v3127_v52 = vld [vmem:[%s3478_s13 + $0x20] sm:$0xff] }
  0xc4   : > { %1677 = vmatpush.bf16.msra.mxu0 %v2614_v16  ;;  %v2663_v16 = vld [vmem:[%s3390_s10 + $0x498] sm:$0xf0]  ;;  %v2618_v17 = vor.u32 %v2979_v6, %v2615_v7 }
  0xc5   : > { %1690 = vmatpush.bf16.msra.mxu1 %v2742_v19  ;;  %v2923_v19 = vld [vmem:[%s3390_s10 + $0x26c] sm:$0xf] }
  0xc6   : > { %1703 = vmatpush.bf16.msra.mxu2 %v2106_v20 }
  0xc7   : > { %1716 = vmatpush.bf16.msra.mxu3 %v2234_v25  ;;  %v2666_v25 = vor.u32 %v2991_v15, %v2663_v16 }
  0xc8   : > { %1678 = vmatpush.bf16.msra.mxu0 %v2598_v32  ;;  %v2987_v32 = vld [vmem:[%s3390_s10 + $0x46c] sm:$0xf] }
  0xc9   : > { %1691 = vmatpush.bf16.msra.mxu1 %v2726_v36  ;;  %v3807_v21 = vpop.f32.mrf.mxu1  ;;  %v2775_v36 = vld [vmem:[%s3390_s10 + $0x578] sm:$0xf0] }
  0xca   : > { %1704 = vmatpush.bf16.msra.mxu2 %v2090_v37  ;;  %v1814_v58 = vpop.xlane.xlu0 %1813  ;;  %v2394_v37 = vor.u32 %v2923_v19, %v2391_v26  ;;  %v2778_v44 = vor.u32 %v3019_v35, %v2775_v36  ;;  %v2943_v19 = vld [vmem:[%s3390_s10 + $0x30c] sm:$0xf] }
  0xcb   : > { %1717 = vmatpush.bf16.msra.mxu3 %v2218_v40  ;;  %v3782_v0 = vmax.f32 %v1814_v58, 1e-30  ;;  %1679 = vmatmul.bf16.vlgmr.msra.gmra.mxu0 %v3565_v51  ;;  %v2650_v40 = vor.u32 %v2987_v32, %v2647_v33  ;;  %v2975_v26 = vld [vmem:[%s3390_s10 + $0x40c] sm:$0xf]  ;;  %v2727_v32 = vld [vmem:[%s3390_s10 + $0x518] sm:$0xf0] }
  0xcc   : > { %1723 = vmatpush.bf16.msrb.mxu0 %v2458_v41  ;;  %1692 = vmatmul.bf16.vlgmr.msra.gmra.mxu1 %v3570_v55  ;;  %v3805_v20 = vpop.f32.mrf.mxu0  ;;  %v2919_v41 = vld [vmem:[%s3390_s10 + $0x24c] sm:$0xf] }
  0xcd   : > { %1736 = vmatpush.bf16.msrb.mxu1 %v2586_v42  ;;  %1705 = vmatmul.bf16.vlgmr.msra.gmra.mxu2 %v3493_v2  ;;  %3119 = vrsqrt.f32 %v3782_v0  ;;  %v2927_v2 = vld [vmem:[%s3390_s10 + $0x28c] sm:$0xf]  ;;  %v2375_v42 = vld [vmem:[%s3390_s10 + $0x258] sm:$0xf0]  ;;  %vm1828_vm0 = vweird.f32 %v3782_v0 }
  0xce   : > { %1749 = vmatpush.bf16.msrb.mxu2 %v2714_v43  ;;  %1718 = vmatmul.bf16.vlgmr.msra.gmra.mxu3 %v3495_v3  ;;  %v2410_v3 = vor.u32 %v2927_v2, %v2407_v11  ;;  %v2951_v43 = vld [vmem:[%s3390_s10 + $0x34c] sm:$0xf]  ;;  %v2378_v53 = vor.u32 %v2919_v41, %v2375_v42  ;;  %v3125_v41 = vld [vmem:[%s3478_s13] sm:$0xff] }
  0xcf   : > { %1762 = vmatpush.bf16.msrb.mxu3 %v2842_v48  ;;  %v2631_v48 = vld [vmem:[%s3390_s10 + $0x458] sm:$0xf0]  ;;  %v3011_v11 = vld [vmem:[%s3390_s10 + $0x52c] sm:$0xf] }
  0xd0   : > { %1724 = vmatpush.bf16.msrb.mxu0 %v2442_v56  ;;  %v2359_v56 = vld [vmem:[%s3390_s10 + $0x238] sm:$0xf0]  ;;  %v2634_v61 = vor.u32 %v2983_v47, %v2631_v48 }
  0xd1   : > { %1737 = vmatpush.bf16.msrb.mxu1 %v2570_v59  ;;  %v1487_v58 = vpop.f32.mrf.mxu1 }
  0xd2   : > { %1750 = vmatpush.bf16.msrb.mxu2 %v2698_v60  ;;  %v1819_v22 = vpop.xlane.xlu0 %1818  ;;  %v2506_v60 = vor.u32 %v2951_v43, %v2503_v45  ;;  %v3126_v43 = vld [vmem:[%s3478_s13 + $0x8] sm:$0xff] }
  0xd3   : > { %1763 = vmatpush.bf16.msrb.mxu3 %v2826_v1  ;;  %v3812_v29 = vpop.eup %3119  ;;  %v3814_v30 = vmax.f32 %v1819_v22, 1e-30  ;;  %v1511_v28 = vpop.f32.mrf.mxu3 }
  0xd4   : > { %1725 = vmatpush.bf16.msrb.mxu0 %v2426_v8  ;;  %v1823_v34 = vmul.f32 %v3812_v29, %v3782_v0  ;;  %vm1829_vm1 = vweird.f32 %v3812_v29  ;;  %v1474_v57 = vpop.f32.mrf.mxu0  ;;  %v2362_v0 = vor.u32 %v2915_v54, %v2359_v56  ;;  %v3128_v54 = vld [vmem:[%s3478_s13 + $0x28] sm:$0xff] }
  0xd5   : > { %1738 = vmatpush.bf16.msrb.mxu1 %v2554_v9  ;;  %3121 = vrsqrt.f32 %v3814_v30  ;;  %vm3843_vm2 = vmor %vm1828_vm0, %vm1829_vm1  ;;  %v1842_v9 = vstv %s3802_s15  ;;  %vm1838_vm3 = vweird.f32 %v3814_v30 }
  0xd6   : > { %1751 = vmatpush.bf16.msrb.mxu2 %v2682_v10  ;;  %v1824_v38 = vmul.f32 %v3812_v29, %v1823_v34  ;;  %v1498_v8 = vpop.f32.mrf.mxu2 }
  0xd7   : > { %1764 = vmatpush.bf16.msrb.mxu3 %v2810_v13  ;;  %v2490_v13 = vor.u32 %v2947_v62, %v2487_v63 }
  0xd8   : > { %1726 = vmatpush.bf16.msrb.mxu0 %v2410_v3  ;;  %v1825_v49 = vmul.f32 0.5, %v1824_v38  ;;  %v2343_v3 = vld [vmem:[%s3390_s10 + $0x218] sm:$0xf0]  ;;  %v1486_v38 = vadd.f32 %v3807_v21, %v3805_v20 }
  0xd9   : > { %1739 = vmatpush.bf16.msrb.mxu1 %v2538_v24  ;;  %v2746_v24 = vor.u32 %v3011_v11, %v2743_v12  ;;  %v2346_v34 = vor.u32 %v2911_v18, %v2343_v3 }
  0xda   : > { %1752 = vmatpush.bf16.msrb.mxu2 %v2666_v25  ;;  %v1826_v59 = vsub.f32 1.5, %v1825_v49  ;;  %v2471_v25 = vld [vmem:[%s3390_s10 + $0x318] sm:$0xf0]  ;;  %v1499_v48 = vadd.f32 %v1498_v8, %v1486_v38 }
  0xdb   : > { %1765 = vmatpush.bf16.msrb.mxu3 %v2794_v31  ;;  %v3122_v1 = vpop.eup %3121  ;;  %v2474_v36 = vor.u32 %v2943_v19, %v2471_v25  ;;  %v1513_v49 = vpop.f32.mrf.mxu3 }
  0xdc   : > { %1727 = vmatpush.bf16.msrb.mxu0 %v2394_v37  ;;  %v1827_v10 = vmul.f32 %v3812_v29, %v1826_v59  ;;  %v1833_v2 = vmul.f32 %v3122_v1, %v3814_v30  ;;  %vm1839_vm4 = vweird.f32 %v3122_v1  ;;  %v2602_v37 = vor.u32 %v2975_v26, %v2599_v27  ;;  %v3129_v27 = vld [vmem:[%s3478_s13 + $0x10] sm:$0xff] }
  0xdd   : > { %1740 = vmatpush.bf16.msrb.mxu1 %v2522_v39  ;;  %vm1840_vm5 = vmor %vm1838_vm3, %vm1839_vm4  ;;  %v1512_v50 = vadd.f32 %v1511_v28, %v1499_v48 }
  0xde   : > { %1753 = vmatpush.bf16.msrb.mxu2 %v2650_v40  ;;  %v1831_v15 = vsel %vm3843_vm2, %v3812_v29, %v1827_v10  ;;  %v1834_v16 = vmul.f32 %v3122_v1, %v1833_v2  ;;  %v3007_v29 = vld [vmem:[%s3390_s10 + $0x50c] sm:$0xf]  ;;  %v1500_v39 = vpop.f32.mrf.mxu2 }
  0xdf   : > { %1766 = vmatpush.bf16.msrb.mxu3 %v2778_v44  ;;  %v1843_v22 = vmul.f32 %v1842_v9, %v1831_v15  ;;  %v2730_v30 = vor.u32 %v3007_v29, %v2727_v32  ;;  %v3131_v32 = vld [vmem:[%s3478_s13 + $0x30] sm:$0xff] }
  0xe0   : > { %1728 = vmatpush.bf16.msrb.mxu0 %v2378_v53  ;;  %v1835_v31 = vmul.f32 0.5, %v1834_v16 }
  0xe1   : > { %1741 = vmatpush.bf16.msrb.mxu1 %v2506_v60  ;;  %v3866_v33 = vadd.f32 %v1846_v14, %v1843_v22 }
  0xe2   : > { %1754 = vmatpush.bf16.msrb.mxu2 %v2634_v61  ;;  %v1836_v35 = vsub.f32 1.5, %v1835_v31  ;;  %v3130_v31 = vld [vmem:[%s3478_s13 + $0x18] sm:$0xff] }
  0xe3   : > { %1767 = vmatpush.bf16.msrb.mxu3 %v2762_v5  ;;  %v1849_v42 = vmul.f32 %v3125_v41, %v3866_v33  ;;  %v1850_v44 = vmul.f32 %v3126_v43, %v3866_v33  ;;  %v1851_v28 = vmul.f32 %v3129_v27, %v3866_v33  ;;  %v1852_v29 = vmul.f32 %v3130_v31, %v3866_v33 }
  0xe4   : > { %1729 = vmatpush.bf16.msrb.mxu0 %v2362_v0  ;;  %v1837_v40 = vmul.f32 %v3122_v1, %v1836_v35  ;;  %v3132_v35 = vld [vmem:[%s3478_s13 + $0x38] sm:$0xff] }
  0xe5   : > { %1742 = vmatpush.bf16.msrb.mxu1 %v2490_v13  ;;  %v1857_v21 = vpack.c.bf16 %v1850_v44, %v1849_v42 }
  0xe6   : > { %1755 = vmatpush.bf16.msrb.mxu2 %v2618_v17  ;;  %v1841_v45 = vsel %vm1840_vm5, %v3122_v1, %v1837_v40 }
  0xe7   : > { %1768 = vmatpush.bf16.msrb.mxu3 %v2746_v24  ;;  %v1844_v47 = vmul.f32 %v1842_v9, %v1841_v45  ;;  %v1865_v58 = vunpack.c.l.b16 %v1857_v21  ;;  %v1866_v1 = vunpack.c.h.b16 %v1857_v21 }
  0xe8   : > { %1730 = vmatpush.bf16.msrb.mxu0 %v2346_v34  ;;  %v1524_v59 = vpop.f32.mrf.mxu0 }
  0xe9   : > { %1743 = vmatpush.bf16.msrb.mxu1 %v2474_v36  ;;  %v1848_v20 = vadd.f32 %v1846_v14, %v1844_v47  ;;  %v1525_v60 = vadd.f32 %v1524_v59, %v1512_v50  ;;  %v1537_v62 = vpop.f32.mrf.mxu1 }
  0xea   : > { %1756 = vmatpush.bf16.msrb.mxu2 %v2602_v37  ;;  %v1858_v37 = vpack.c.bf16 %v1852_v29, %v1851_v28 }
  0xeb   : > { %1769 = vmatpush.bf16.msrb.mxu3 %v2730_v30  ;;  %1731 = vmatmul.bf16.vlgmr.msrb.gmra.mxu0 %v3508_v23  ;;  %v1853_v53 = vmul.f32 %v3127_v52, %v1848_v20  ;;  %v1854_v56 = vmul.f32 %v3128_v54, %v1848_v20  ;;  %v1538_v63 = vadd.f32 %v1537_v62, %v1525_v60 }
  0xec   : > { %1744 = vmatmul.bf16.vlgmr.msrb.gmra.mxu1 %v3522_v46  ;;  %v1855_v34 = vmul.f32 %v3131_v32, %v1848_v20  ;;  %v1856_v36 = vmul.f32 %v3132_v35, %v1848_v20  ;;  %v1867_v30 = vunpack.c.l.b16 %v1858_v37  ;;  %v1868_v43 = vunpack.c.h.b16 %v1858_v37 }
  0xed   : > { %1757 = vmatmul.bf16.vlgmr.msrb.gmra.mxu2 %v3565_v51  ;;  %v1859_v57 = vpack.c.bf16 %v1854_v56, %v1853_v53  ;;  %v1881_v5 = vpack.c.bf16 %v1538_v63, %v1538_v63  ;;  %v1775_v3 = vmul.f32 %v1538_v63, %v1538_v63 }
  0xee   : > { %1770 = vmatmul.bf16.vlgmr.msrb.gmra.mxu3 %v3570_v55  ;;  %v1860_v38 = vpack.c.bf16 %v1856_v36, %v1855_v34  ;;  %v1937_v36 = vstv %s296_s25 }
  0xef   : > { %v1869_v61 = vunpack.c.l.b16 %v1859_v57  ;;  %v1870_v46 = vunpack.c.h.b16 %v1859_v57 }
  0xf0   : > { %v1550_v4 = vpop.f32.mrf.mxu2  ;;  %v1526_v6 = vpop.f32.mrf.mxu0  ;;  %v1871_v39 = vunpack.c.l.b16 %v1860_v38  ;;  %v1872_v44 = vunpack.c.h.b16 %v1860_v38 }
  0xf1   : > { %v1873_v23 = vpack.c.b16 %v1869_v61, %v1865_v58  ;;  %v1874_v51 = vpack.c.b16 %v1870_v46, %v1866_v1  ;;  %v1563_v55 = vpop.f32.mrf.mxu3  ;;  %v1539_v7 = vpop.f32.mrf.mxu1 }
  0xf2   : > { %v1564_v10 = vadd.f32 %v1563_v55, %v1550_v4  ;;  %v1875_v40 = vpack.c.b16 %v1871_v39, %v1867_v30  ;;  %v1876_v45 = vpack.c.b16 %v1872_v44, %v1868_v43 }
  0xf3   : > { %1892 = vmatpush.bf16.xpose.msra.mxu0 %v1873_v23  ;;  %1905 = vmatpush.bf16.xpose.msra.mxu1 %v1874_v51 }
  0xf4   : > { %1918 = vmatpush.bf16.xpose.msra.mxu2 %v1875_v40  ;;  %1931 = vmatpush.bf16.xpose.msra.mxu3 %v1876_v45 }
  0xf8   : > { %v1552_v8 = vpop.f32.mrf.mxu2 }
  0xf9   : > { %v1565_v9 = vpop.f32.mrf.mxu3 }
  0xfb   : > { %1893 = vmatmul.bf16.vlgmr.msra.gmra.mxu0 %v1881_v5 }
 0x108   : > { %v1576_v2 = vpop.f32.mrf.mxu0 }
 0x109   : > { %v1577_v11 = vadd.f32 %v1576_v2, %v1564_v10  ;;  %v1589_v12 = vpop.f32.mrf.mxu1 }
 0x10b   : > { %v1590_v0 = vadd.f32 %v1589_v12, %v1577_v11 }
 0x110   : > { %v1602_v13 = vpop.f32.mrf.mxu2  ;;  %v1578_v17 = vpop.f32.mrf.mxu0 }
 0x111   : > { %v1603_v14 = vadd.f32 %v1602_v13, %v1590_v0  ;;  %v1615_v15 = vpop.f32.mrf.mxu3  ;;  %v1591_v18 = vpop.f32.mrf.mxu1 }
 0x113   : > { %v1616_v16 = vadd.f32 %v1615_v15, %v1603_v14 }
 0x115   : > { %v1776_v19 = vmul.f32 %v1616_v16, %v1616_v16  ;;  %v1882_v22 = vpack.c.bf16 %v1616_v16, %v1616_v16 }
 0x117   : > { %1906 = vmatmul.bf16.vlgmr.msra.gmra.mxu1 %v1882_v22  ;;  %v1779_v24 = vadd.f32 %v1776_v19, %v1775_v3 }
 0x118   : > { %v1604_v25 = vpop.f32.mrf.mxu2 }
 0x119   : > { %v1617_v26 = vpop.f32.mrf.mxu3 }
 0x128   : > { %v1628_v41 = vpop.f32.mrf.mxu0 }
 0x129   : > { %v1641_v42 = vpop.f32.mrf.mxu1 }
 0x12a   : > { %v1642_v52 = vadd.f32 %v1641_v42, %v1628_v41 }
 0x130   : > { %v1654_v47 = vpop.f32.mrf.mxu2  ;;  %v1630_v48 = vpop.f32.mrf.mxu0 }
 0x131   : > { %v1667_v49 = vpop.f32.mrf.mxu3  ;;  %v1643_v33 = vpop.f32.mrf.mxu1  ;;  %v1655_v20 = vadd.f32 %v1654_v47, %v1642_v52 }
 0x133   : > { %v1668_v53 = vadd.f32 %v1667_v49, %v1655_v20 }
 0x138   : > { %v1656_v21 = vpop.f32.mrf.mxu2 }
 0x139   : > { %v1669_v50 = vpop.f32.mrf.mxu3 }
 0x148   : > { %v1680_v54 = vpop.f32.mrf.mxu0 }
 0x149   : > { %v1681_v56 = vadd.f32 %v1680_v54, %v1668_v53  ;;  %v1693_v57 = vpop.f32.mrf.mxu1 }
 0x14b   : > { %v1694_v58 = vadd.f32 %v1693_v57, %v1681_v56 }
 0x14d   : > { %v1883_v59 = vpack.c.bf16 %v1694_v58, %v1694_v58  ;;  %v1777_v7 = vmul.f32 %v1694_v58, %v1694_v58 }
 0x14f   : > { %1919 = vmatmul.bf16.vlgmr.msra.gmra.mxu2 %v1883_v59  ;;  %v1780_v13 = vadd.f32 %v1779_v24, %v1777_v7 }
 0x150   : > { %v1706_v60 = vpop.f32.mrf.mxu2  ;;  %v1682_v62 = vpop.f32.mrf.mxu0 }
 0x151   : > { %v1719_v61 = vpop.f32.mrf.mxu3  ;;  %v1695_v23 = vpop.f32.mrf.mxu1 }
 0x152   : > { %v1720_v46 = vadd.f32 %v1719_v61, %v1706_v60 }
 0x158   : > { %v1708_v63 = vpop.f32.mrf.mxu2 }
 0x159   : > { %v1721_v1 = vpop.f32.mrf.mxu3 }
 0x168   : > { %v1732_v51 = vpop.f32.mrf.mxu0 }
 0x169   : > { %v1745_v4 = vpop.f32.mrf.mxu1  ;;  %v1733_v5 = vadd.f32 %v1732_v51, %v1720_v46 }
 0x16b   : > { %v1746_v55 = vadd.f32 %v1745_v4, %v1733_v5 }
 0x170   : > { %v1758_v6 = vpop.f32.mrf.mxu2  ;;  %v1734_v10 = vpop.f32.mrf.mxu0 }
 0x171   : > { %v1759_v8 = vadd.f32 %v1758_v6, %v1746_v55  ;;  %v1771_v9 = vpop.f32.mrf.mxu3  ;;  %v1747_v2 = vpop.f32.mrf.mxu1 }
 0x173   : > { %v1772_v11 = vadd.f32 %v1771_v9, %v1759_v8 }
 0x175   : > { %v1884_v12 = vpack.c.bf16 %v1772_v11, %v1772_v11  ;;  %v1778_v0 = vmul.f32 %v1772_v11, %v1772_v11 }
 0x177   : > { %1932 = vmatmul.bf16.vlgmr.msra.gmra.mxu3 %v1884_v12  ;;  %v1781_v14 = vadd.f32 %v1780_v13, %v1778_v0 }
 0x178   : > { %v1760_v15 = vpop.f32.mrf.mxu2  ;;  %v1894_v17 = vpop.f32.mrf.mxu0 }
 0x179   : > { %v1773_v16 = vpop.f32.mrf.mxu3  ;;  %1782 = vadd.xlane.f32.xlu1 %v1781_v14 }
 0x180   : > { %v1896_v18 = vpop.f32.mrf.mxu0 }
 0x194   : > { %v1907_v3 = vpop.f32.mrf.mxu1 }
 0x195   : > { %v1908_v19 = vadd.f32 %v1907_v3, %v1894_v17 }
 0x19c   : > { %v1909_v22 = vpop.f32.mrf.mxu1 }
 0x1d2   : > { %v1920_v25 = vpop.f32.mrf.mxu2 }
 0x1d3   : > { %v1921_v37 = vadd.f32 %v1920_v25, %v1908_v19 }
 0x1da   : > { %v1922_v26 = vpop.f32.mrf.mxu2 }
 0x1ec   : > { %v1783_v27 = vpop.xlane.xlu1 %1782 }
 0x1ed   : > { %3123 = vrsqrt.f32 %v1783_v27  ;;  %vm1790_vm7 = vweird.f32 %v1783_v27 }
 0x1f3   : > { %v3124_v28 = vpop.eup %3123 }
 0x1f4   : > { %v1785_v31 = vmul.f32 %v3124_v28, %v1783_v27  ;;  %vm1791_vm6 = vweird.f32 %v3124_v28 }
 0x1f5   : > { %vm1792_vm8 = vmor %vm1790_vm7, %vm1791_vm6 }
 0x1f6   : > { %v1786_v24 = vmul.f32 %v3124_v28, %v1785_v31 }
 0x1f8   : > { %v1787_v29 = vmul.f32 0.5, %v1786_v24 }
 0x1fa   : > { %v1788_v32 = vsub.f32 1.5, %v1787_v29  ;;  %v1933_v34 = vpop.f32.mrf.mxu3 }
 0x1fb   : > { %v1934_v30 = vadd.f32 %v1933_v34, %v1921_v37 }
 0x1fc   : > { %v1789_v35 = vmul.f32 %v3124_v28, %v1788_v32 }
 0x1fe   : > { %v1793_v38 = vsel %vm1792_vm8, %v3124_v28, %v1789_v35 }
 0x1ff   : > { %v1938_v39 = vmul.f32 %v1937_v36, %v1793_v38 }
 0x201   : > { %v1939_v40 = vmul.f32 %v1938_v39, %v1934_v30 }
 0x202   : > { %v1935_v41 = vpop.f32.mrf.mxu3 }
 0x203   : > { %1940 = vst [vmem:[%s294_s5] sm:$0xff] %v1939_v40 }
 0x204 PF: > { %s19_s20 = sadd.s32 1, %s3266_s20   ;;  %s3920_s15 = smov %s3250_s16 }
 0x205   : > { %p16_p2 = scmp.ge.s32.totalorder %s19_s20, 4   ;;  %s3921_s16 = smov %s3254_s17 }
 0x206   : > { %s3922_s17 = smov %s3375_s30  ;;  %s3923_s18 = smov %s3262_s19 }
 0x207   : > { %s3924_s19 = smov %s3926_s11  ;;  %18 = sbr.rel (!%p16_p2) target bundleno = 6 (0x6), region = 90 }
 0x20c   :  { %1966 = vsyncpa [#allocation3], 1 }
 0x20d   :  { %1968 = vsyncpa [#allocation3 + $0x1], 1 }
 0x20e   :  { %1969 = vsyncpa [#allocation7], 1 }
 0x20f   :  { %1971 = vsyncpa [#allocation7 + $0x1], 1 }
 0x210   :  { %1972 = vsyncpa [#allocation4], 1 }
 0x211   :  { %1974 = vsyncpa [#allocation4 + $0x1], 1 }

</bundles_post_ra>
